<compile_context>
chip_gen: v7x
topology: tpu7x:2x2x1
jax: 0.10.0
libtpu: 0.0.40
codegen_flags: <defaults>
</compile_context>

<pallas_src>
import jax
import jax.numpy as jnp
from jax import lax
from jax.experimental import pallas as pl
from jax.experimental.pallas import tpu as pltpu


_LANE = 128
_E_BYTES_CAP = 1 << 20      # keep the one-hot expansion matrix <= 1 MiB


def _se_scale_kernel(g_ref, x_ref, o_ref):
    """out = x * sigmoid(g).

    g_ref: (R, k)      -- k per-channel gate logits per row (lane-dense)
    x_ref: (R, k*HW)   -- matching k*HW feature values per row (lane-dense)
    """
    k = g_ref.shape[-1]
    width = x_ref.shape[-1]
    hw = width // k

    # Sigmoid on the compact (R, k) block (EUP, f32) -- no redundant work on
    # 128 padded lanes like the old (NC, 1) layout had.
    gate = jax.nn.sigmoid(g_ref[...].astype(jnp.float32))              # (R, k)

    # One-hot expansion matrix E[c, l] = 1.0 iff lane l belongs to channel c,
    # i.e. l in [c*hw, (c+1)*hw).  Built with iota/compare (no integer div),
    # then the widening itself runs on the otherwise idle MXU.  K = k <= 128,
    # so the matmul is tiny; HIGHEST precision keeps the f32 gate exact.
    lane = lax.broadcasted_iota(jnp.int32, (k, width), 1)
    chan = lax.broadcasted_iota(jnp.int32, (k, width), 0)
    lo = chan * hw
    expand = jnp.logical_and(lane >= lo, lane < lo + hw).astype(jnp.float32)
    gate_wide = jnp.dot(gate, expand,
                        preferred_element_type=jnp.float32,
                        precision=lax.Precision.HIGHEST)               # (R, width)

    # Multiply in f32 and round once on the store (addresses the bf16 note).
    o_ref[...] = (x_ref[...].astype(jnp.float32) * gate_wide).astype(o_ref.dtype)


def _se_scale_sparse_kernel(g_ref, x_ref, o_ref):
    """Fallback when no channel packing applies (N*C not divisible by 8)."""
    gate = jax.nn.sigmoid(g_ref[...].astype(jnp.float32))              # (NC, 1)
    o_ref[...] = (x_ref[...].astype(jnp.float32) * gate).astype(o_ref.dtype)


def _choose_channel_pack(nc, hw):
    """How many channels k to pack per row so the lane dim is dense.

    Returns a divisor k of nc (8..128) or None if no usable packing exists.
    Smallest k reaching >=90% lane utilisation wins (bigger k only inflates
    the one-hot matrix that must be built/streamed every call)."""
    candidates = []
    for k in (8, 16, 32, 64, 128):
        if nc % k:
            continue
        if k * k * hw * 4 > _E_BYTES_CAP:
            continue
        lanes = k * hw
        util = lanes / (pl.cdiv(lanes, _LANE) * _LANE)
        candidates.append((k, util))
    if not candidates:
        return None
    dense = [k for k, u in candidates if u >= 0.90]
    if dense:
        return min(dense)
    return max(candidates, key=lambda ku: ku[1])[0]


def _vmem_budget_bytes():
    """Conservative per-kernel VMEM budget (v5e/v6e: 128 MiB, v7x: 64 MiB)."""
    try:
        cap = int(pltpu.get_tpu_info().vmem_capacity_bytes)
    except Exception:
        cap = 64 << 20
    return min(cap // 2, 24 << 20)


def sigmoid_mul(x, gate_logits):
    """x: (N, C, H, W), gate_logits: (N, C, 1, 1) -> x * sigmoid(gate_logits)."""
    N, C, H, W = x.shape
    assert gate_logits.shape == (N, C, 1, 1)
    NC, HW = N * C, H * W
    itemsize = jnp.dtype(x.dtype).itemsize

    k = _choose_channel_pack(NC, HW)
    budget = _vmem_budget_bytes()

    if k is None:
        # TODO(synk): tile this fallback for very large tensors whose N*C is
        # not divisible by 8; common SE shapes never reach it.
        g2d = gate_logits.reshape(NC, 1)
        x2d = x.reshape(NC, HW)
        out2d = pl.pallas_call(
            _se_scale_sparse_kernel,
            out_shape=jax.ShapeDtypeStruct((NC, HW), x.dtype),
            in_specs=[pl.BlockSpec(memory_space=pltpu.MemorySpace.VMEM),
                      pl.BlockSpec(memory_space=pltpu.MemorySpace.VMEM)],
            out_specs=pl.BlockSpec(memory_space=pltpu.MemorySpace.VMEM),
            compiler_params=pltpu.CompilerParams(vmem_limit_bytes=32 << 20),
        )(g2d, x2d)
        return out2d.reshape(N, C, H, W)

    rows, width = NC // k, k * HW
    x2d = x.reshape(rows, width)            # free: same contiguous HBM layout
    g2d = gate_logits.reshape(rows, k)      # free

    e_bytes = k * k * HW * 4
    padded_row = pl.cdiv(width, _LANE) * _LANE
    f32_copies = 1 + (1 if itemsize < 4 else 0)       # gate_wide (+ f32 x copy)
    single_est = (rows * padded_row * itemsize * 2            # in + out, 1-buffered
                  + rows * padded_row * 4 * f32_copies        # f32 temporaries
                  + e_bytes + (1 << 20))                      # one-hot + slack

    if single_est <= budget:
        # Single un-gridded block: whole arrays in VMEM, single buffered, no
        # per-step pipeline overhead, no pointless double buffering.
        vlim = int(min(max(single_est + (8 << 20), 16 << 20), 48 << 20))
        out2d = pl.pallas_call(
            _se_scale_kernel,
            out_shape=jax.ShapeDtypeStruct((rows, width), x.dtype),
            in_specs=[pl.BlockSpec(memory_space=pltpu.MemorySpace.VMEM),
                      pl.BlockSpec(memory_space=pltpu.MemorySpace.VMEM)],
            out_specs=pl.BlockSpec(memory_space=pltpu.MemorySpace.VMEM),
            compiler_params=pltpu.CompilerParams(vmem_limit_bytes=vlim),
        )(g2d, x2d)
        return out2d.reshape(N, C, H, W)

    # Large tensors: row-tiled grid so HBM read / compute / writeback overlap.
    per_row = padded_row * (2 * 2 * itemsize + 4 * f32_copies)  # 2x-buffered io + f32 temps
    tile_r = max(8, ((budget - e_bytes - (1 << 20)) // per_row) // 8 * 8)
    for cand in range(tile_r, 7, -8):        # prefer a divisor of rows (no ragged edge)
        if rows % cand == 0:
            tile_r = cand
            break
    tile_r = min(tile_r, rows)
    grid = (pl.cdiv(rows, tile_r),)
    out2d = pl.pallas_call(
        _se_scale_kernel,
        out_shape=jax.ShapeDtypeStruct((rows, width), x.dtype),
        grid=grid,
        in_specs=[pl.BlockSpec((tile_r, k), lambda i: (i, 0)),
                  pl.BlockSpec((tile_r, width), lambda i: (i, 0))],
        out_specs=pl.BlockSpec((tile_r, width), lambda i: (i, 0)),
        compiler_params=pltpu.CompilerParams(
            dimension_semantics=("parallel",),
            vmem_limit_bytes=int(min(budget + (8 << 20), 48 << 20)),
        ),
    )(g2d, x2d)
    return out2d.reshape(N, C, H, W)


if __name__ == "__main__":
    key = jax.random.PRNGKey(0)
    k1, k2 = jax.random.split(key)

    # Small shapes consistent with the module's (1, 2304, 7, 7) / (1, 2304, 1, 1).
    N, C, H, W = 1, 256, 7, 7
    x625 = jax.random.normal(k1, (N, C, H, W), dtype=jnp.float32)
    x629 = jax.random.normal(k2, (N, C, 1, 1), dtype=jnp.float32)

    out = jax.block_until_ready(sigmoid_mul(x625, x629))
    ref = x625 * jax.nn.sigmoid(x629)
    assert out.shape == (N, C, H, W)
    assert jnp.allclose(out, ref, atol=1e-5, rtol=1e-5), \
        float(jnp.max(jnp.abs(out - ref)))

    # bf16 variant: gate math stays in f32 inside the kernel, only the final
    # store rounds -> loose tolerance for the bf16 output rounding.
    x_bf = x625.astype(jnp.bfloat16)
    s_bf = x629.astype(jnp.bfloat16)
    out_bf = jax.block_until_ready(sigmoid_mul(x_bf, s_bf))
    ref_bf = x_bf.astype(jnp.float32) * jax.nn.sigmoid(s_bf.astype(jnp.float32))
    assert jnp.allclose(out_bf.astype(jnp.float32), ref_bf, atol=2e-2, rtol=2e-2)

    print("KERNEL_OK")
</pallas_src>

<mosaic_0001>
module attributes {stable_mosaic.version = 11 : i64} {
  func.func @_se_scale_kernel(%arg0: memref<8x32xf32, #tpu.memory_space<vmem>>, %arg1: memref<8x1568xf32, #tpu.memory_space<vmem>>, %arg2: memref<8x1568xf32, #tpu.memory_space<vmem>>) attributes {dimension_semantics = [], scalar_prefetch = 0 : i64, scratch_operands = 0 : i64, tpu.core_type = #tpu.core_type<tc>} {
    %c0 = arith.constant 0 : index
    %c0_0 = arith.constant 0 : index
    %0 = vector.load %arg0[%c0, %c0_0] : memref<8x32xf32, #tpu.memory_space<vmem>>, vector<8x32xf32>
    %1 = arith.negf %0 : vector<8x32xf32>
    %2 = math.exp %1 : vector<8x32xf32>
    %cst = arith.constant 1.000000e+00 : f32
    %3 = vector.broadcast %cst : f32 to vector<8x32xf32>
    %4 = arith.addf %3, %2 : vector<8x32xf32>
    %5 = arith.divf %3, %4 : vector<8x32xf32>
    %6 = tpu.iota {dimensions = array<i32: 1>} : vector<32x1568xi32>
    %7 = tpu.iota {dimensions = array<i32: 0>} : vector<32x1568xi32>
    %c49_i32 = arith.constant 49 : i32
    %8 = vector.broadcast %c49_i32 : i32 to vector<32x1568xi32>
    %9 = arith.muli %7, %8 : vector<32x1568xi32>
    %10 = arith.cmpi sge, %6, %9 : vector<32x1568xi32>
    %c49_i32_1 = arith.constant 49 : i32
    %11 = vector.broadcast %c49_i32_1 : i32 to vector<32x1568xi32>
    %12 = arith.addi %9, %11 : vector<32x1568xi32>
    %13 = arith.cmpi slt, %6, %12 : vector<32x1568xi32>
    %14 = arith.andi %10, %13 : vector<32x1568xi1>
    %15 = arith.extui %14 : vector<32x1568xi1> to vector<32x1568xi32>
    %16 = arith.sitofp %15 : vector<32x1568xi32> to vector<32x1568xf32>
    %cst_2 = arith.constant dense<0.000000e+00> : vector<8x1568xf32>
    %17 = tpu.matmul %5, %16, %cst_2 {dimension_numbers = #tpu.dot_dimension_numbers<[1], [0], [0], [1], [0, 0, 1, 1], [], []>, precision = #tpu.contract_precision<fp32>} : vector<8x32xf32>, vector<32x1568xf32>, vector<8x1568xf32> -> vector<8x1568xf32>
    %c0_3 = arith.constant 0 : index
    %c0_4 = arith.constant 0 : index
    %18 = vector.load %arg1[%c0_3, %c0_4] : memref<8x1568xf32, #tpu.memory_space<vmem>>, vector<8x1568xf32>
    %19 = arith.mulf %18, %17 : vector<8x1568xf32>
    %c0_5 = arith.constant 0 : index
    %c0_6 = arith.constant 0 : index
    %20 = vector.load %arg2[%c0_5, %c0_6] : memref<8x1568xf32, #tpu.memory_space<vmem>>, vector<8x1568xf32>
    tpu.vector_store %arg2[%c0_5, %c0_6], %19 {strides = array<i32>} : memref<8x1568xf32, #tpu.memory_space<vmem>>, vector<8x1568xf32>,
    return
  }
}

</mosaic_0001>

<bundles_post_ra>
// kernel: tpu_custom_call.1
= control target key start
LH: loop header
LB: loop body
LE: loop exit
PB: predicated region body
PF: predicated region fallthrough
CT: control target
= control target key end

     0   :  { %7 = vsyncpa [#allocation3], 0  ;;  %s6777_s0 = inlined_call_operand.hbm [shape: f32[8,32], index: 0, kind: input, shape index: {}]   ;;  %s6778_s1 = inlined_call_operand.hbm [shape: f32[8,1568], index: 1, kind: input, shape index: {}]   ;;  %s6779_s2 = inlined_call_operand.hbm [shape: f32[8,1568], index: 2, kind: output, shape index: {}]  }
   0x1   :  { %8 = vsyncpa [#allocation6], 0 }
   0x2   :  { %9 = vsyncpa [#allocation4], 0  ;;  %s4914_s9 = smov [#allocation2]   ;;  %s4915_s11 = smov [#allocation5]  }
   0x3   :  { %s16_s10 = sshll.u32 %s4914_s9, 4  ;;  %s26_s12 = sshll.u32 %s4915_s11, 4  ;;  %s17_s10 = int_to_ptr.vmem [resolvable:$true] %s16_s10  ;;  %s27_s12 = int_to_ptr.vmem [resolvable:$true] %s26_s12 }
   0x4   :  { %s4842_s15 = scalar_lea.hbm %s6777_s0, 128 }
   0x5   :  { %p4843_p0 = scmp.ne.s32.totalorder %s6777_s0, %s4842_s15  ;;  %p4846_p1 = scmp.lt.u32.totalorder %s4842_s15, %s6777_s0 }
   0x7   :  { %p4848_p2 = pnand %p4846_p1, %p4843_p0 }
   0x9   :  { %4851 = shalt.err (!%p4848_p2)
}
   0xa   :  { %s4852_s20 = scalar_lea.vmem %s17_s10, 128  ;;  %p4857_p4 = scmp.lt.s32.totalorder %s17_s10, %s17_s10 }
   0xb   :  { %p4853_p3 = scmp.ne.s32.totalorder %s17_s10, %s4852_s20  ;;  %p4858_p5 = scmp.lt.s32.totalorder %s4852_s20, %s4852_s20 }
   0xd   :  { %p4859_p6 = por %p4858_p5, %p4857_p4 }
   0xf   :  { %p4860_p7 = pnand %p4859_p6, %p4853_p3 }
  0x11   :  { %4863 = shalt.err (!%p4860_p7)
}
  0x12   :  { %19 = dma.hbm_to_vmem [thread:$0]  %s6777_s0, 128, %s17_s10, [#allocation3]  }
  0x13   :  { %s4864_s25 = scalar_lea.hbm %s6778_s1, 1664 }
  0x14   :  { %p4865_p8 = scmp.ne.s32.totalorder %s6778_s1, %s4864_s25  ;;  %p4868_p9 = scmp.lt.u32.totalorder %s4864_s25, %s6778_s1 }
  0x16   :  { %p4870_p10 = pnand %p4868_p9, %p4865_p8 }
  0x18   :  { %4873 = shalt.err (!%p4870_p10)
}
  0x19   :  { %s4874_s30 = scalar_lea.vmem %s27_s12, 1664  ;;  %p4879_p12 = scmp.lt.s32.totalorder %s27_s12, %s27_s12 }
  0x1a   :  { %p4875_p11 = scmp.ne.s32.totalorder %s27_s12, %s4874_s30  ;;  %p4880_p13 = scmp.lt.s32.totalorder %s4874_s30, %s4874_s30 }
  0x1c   :  { %p4881_p0 = por %p4880_p13, %p4879_p12 }
  0x1e   :  { %p4882_p1 = pnand %p4881_p0, %p4875_p11 }
  0x20   :  { %4885 = shalt.err (!%p4882_p1)
}
  0x21   :  { %29 = dma.hbm_to_vmem [thread:$0]  %s6778_s1, 1664, %s27_s12, [#allocation6]  }
  0x22   :  { %4908 = dma.done.wait [#allocation3], 128  }
  0x23   :  { %4909 = vsyncadd [#allocation3], 4294967168 }
  0x24   :  { %4910 = dma.done.wait [#allocation6], 1664  }
  0x25   :  { %4911 = vsyncadd [#allocation6], 4294965632  ;;  %v43_v0 = vlaneseq  ;;  %v6788_v1 = vmov 0.0   ;;  %v36_v19 = vld [vmem:[#allocation2] sm:$0xff]  ;;  %v6791_v23 = vmov 1.0|1.0  }
  0x26   :  { %691 = vmatprep.mubr.f32.mxu0 %v6788_v1  ;;  %406 = vmatprep.mubr.f32.mxu1 %v6788_v1  ;;  %v4132_v27 = vmul.f32 -1.442695, %v36_v19  ;;  %v6838_v34 = vmov 0  ;;  %v6844_v42 = vmov 0  ;;  %v6891_v26 = vmov 0.0   ;;  %s4920_s1 = smov [#allocation7]  }
  0x27   :  { %v4962_v2 = vand.u32 127, %v43_v0  ;;  %v58_v3 = vshrl.u32 %v43_v0, 7  ;;  %s4122_s4 = sshll.u32 %s4920_s1, 4  ;;  %s4123_s4 = int_to_ptr.vmem [resolvable:$true] %s4122_s4 }
  0x28   :  { %4838 = vpow2.f32 %v4132_v27  ;;  %s4886_s5 = scalar_lea.vmem %s4123_s4, 1664  ;;  %p4891_p3 = scmp.lt.s32.totalorder %s4123_s4, %s4123_s4 }
  0x29   :  { %v45_v4 = vadd.s32 128, %v4962_v2  ;;  %v59_v5 = vadd.s32 8, %v58_v3  ;;  %v4965_v6 = vmul.u32 49, %v58_v3  ;;  %v60_v7 = vadd.s32 16, %v58_v3  ;;  %p4887_p2 = scmp.ne.s32.totalorder %s4123_s4, %s4886_s5  ;;  %p4892_p4 = scmp.lt.s32.totalorder %s4886_s5, %s4886_s5 }
  0x2a   :  { %v61_v8 = vadd.s32 24, %v58_v3  ;;  %v5127_v55 = vadd.s32 640, %v4962_v2  ;;  %v5138_v62 = vadd.s32 512, %v4962_v2 }
  0x2b   :  { %v4967_v9 = vmul.u32 49, %v59_v5  ;;  %vm67_vm0 = vcmp.ge.s32.totalorder %v45_v4, %v4965_v6  ;;  %v4971_v10 = vadd.s32 49, %v4965_v6  ;;  %vm66_vm1 = vcmp.ge.s32.totalorder %v4962_v2, %v4965_v6  ;;  %p4893_p5 = por %p4892_p4, %p4891_p3 }
  0x2c   :  { %v4975_v11 = vmul.u32 49, %v60_v7  ;;  %v4977_v12 = vmul.u32 49, %v61_v8  ;;  %v6846_v8 = vmov 0 }
  0x2d   :  { %vm80_vm2 = vcmp.ge.s32.totalorder %v45_v4, %v4967_v9  ;;  %v4981_v13 = vadd.s32 49, %v4967_v9  ;;  %vm123_vm3 = vcmp.lt.s32.totalorder %v45_v4, %v4971_v10  ;;  %vm79_vm5 = vcmp.ge.s32.totalorder %v4962_v2, %v4967_v9  ;;  %p4894_p6 = pnand %p4893_p5, %p4887_p2 }
  0x2e   :  { %vm175_vm4 = vmand %vm67_vm0, %vm123_vm3  ;;  %vm122_vm6 = vcmp.lt.s32.totalorder %v4962_v2, %v4971_v10  ;;  %v4989_v14 = vadd.s32 49, %v4975_v11  ;;  %v5000_v17 = vadd.s32 49, %v4977_v12  ;;  %vm93_vm12 = vcmp.ge.s32.totalorder %v45_v4, %v4975_v11 }
  0x2f   :  { %vm136_vm7 = vcmp.lt.s32.totalorder %v45_v4, %v4981_v13  ;;  %v4134_v15 = vsel %vm175_vm4, 1.0, %v6788_v1  ;;  %vm135_vm8 = vcmp.lt.s32.totalorder %v4962_v2, %v4981_v13  ;;  %vm4995_vm9 = vmand %vm66_vm1, %vm122_vm6  ;;  %vm106_vm15 = vcmp.ge.s32.totalorder %v45_v4, %v4977_v12 }
  0x30   :  { %vm188_vm10 = vmand %vm80_vm2, %vm136_vm7  ;;  %v5002_v18 = vsub.f32 %v4134_v15, %v4134_v15  ;;  %vm149_vm13 = vcmp.lt.s32.totalorder %v45_v4, %v4989_v14  ;;  %vm162_vm0 = vcmp.lt.s32.totalorder %v45_v4, %v5000_v17  ;;  %vm92_vm3 = vcmp.ge.s32.totalorder %v4962_v2, %v4975_v11 }
  0x31   :  { %v4147_v20 = vsel %vm188_vm10, 1.0, %v6788_v1  ;;  %vm5005_vm11 = vmpackc.low %vm188_vm10, %vm175_vm4  ;;  %vm148_vm4 = vcmp.lt.s32.totalorder %v4962_v2, %v4989_v14  ;;  %vm105_vm6 = vcmp.ge.s32.totalorder %v4962_v2, %v4977_v12  ;;  %vm161_vm7 = vcmp.lt.s32.totalorder %v4962_v2, %v5000_v17 }
  0x32   :  { %v5011_v22 = vsub.f32 %v4147_v20, %v4147_v20  ;;  %4462 = vmatprep.subr.msk.bf16.mxu0 %vm5005_vm11, %v6791_v23  ;;  %vm5019_vm14 = vmand %vm79_vm5, %vm135_vm8  ;;  %4438 = vmatprep.subr.msk.bf16.mxu1 %vm5005_vm11, %v6791_v23  ;;  %v420_v25 = vand.u32 4294901760, %v5002_v18  ;;  %v4133_v32 = vsel %vm4995_vm9, 1.0, %v6788_v1  ;;  %v4839_v50 = vpop.eup %4838  ;;  %v5155_v15 = vadd.s32 384, %v4962_v2 }
  0x33   :  { %vm5033_vm1 = vmpackc.low %vm5019_vm14, %vm4995_vm9  ;;  %v4146_v33 = vsel %vm5019_vm14, 1.0, %v6788_v1  ;;  %v5090_v40 = vsub.f32 %v4133_v32, %v4133_v32  ;;  %v40_v54 = vadd.f32 1.0, %v4839_v50  ;;  %vm127_vm14 = vcmp.lt.s32.totalorder %v5127_v55, %v4971_v10 }
  0x34   :  { %4464 = vmatpush1.bf16.msk.msra.mxu0 %vm5033_vm1, %v6791_v23  ;;  %vm5040_vm2 = vmand %vm93_vm12, %vm149_vm13  ;;  %4440 = vmatpush1.bf16.msk.msra.mxu1 %vm5033_vm1, %v6791_v23  ;;  %v432_v29 = vand.u32 4294901760, %v5011_v22  ;;  %v421_v30 = vsub.f32 %v5002_v18, %v420_v25  ;;  %v5092_v41 = vsub.f32 %v4146_v33, %v4146_v33  ;;  %vm71_vm13 = vcmp.ge.s32.totalorder %v5127_v55, %v4965_v6 }
  0x35   :  { %vm5053_vm5 = vmand %vm106_vm15, %vm162_vm0  ;;  %v4160_v44 = vsel %vm5040_vm2, 1.0, %v6788_v1  ;;  %v426_v47 = vand.u32 4294901760, %v5090_v40  ;;  %4840 = vrcp.f32 %v40_v54  ;;  %vm6780_vm15 = vcmask 261120  }
  0x36   :  { %vm5071_vm8 = vmpackc.low %vm5053_vm5, %vm5040_vm2  ;;  %v4469_v36 = vpack.c.bf16 %v432_v29, %v420_v25  ;;  %v422_v37 = vand.u32 4294901760, %v421_v30  ;;  %v433_v38 = vsub.f32 %v5011_v22, %v432_v29  ;;  %v4173_v46 = vsel %vm5053_vm5, 1.0, %v6788_v1 }
  0x37   :  { %v6839_v34 = vsel %vm5071_vm8, 4294967295, %v6838_v34  ;;  %4466 = vmatprep.subr.msk.bf16.mxu0 %vm5071_vm8, %v6791_v23  ;;  %vm5078_vm10 = vmand %vm92_vm3, %vm148_vm4  ;;  %4442 = vmatprep.subr.msk.bf16.mxu1 %vm5071_vm8, %v6791_v23  ;;  %v438_v48 = vand.u32 4294901760, %v5092_v41  ;;  %v5116_v49 = vsub.f32 %v4160_v44, %v4160_v44  ;;  %v5118_v51 = vsub.f32 %v4173_v46, %v4173_v46 }
  0x38   :  { %vm5086_vm9 = vmand %vm105_vm6, %vm161_vm7  ;;  %v434_v43 = vand.u32 4294901760, %v433_v38  ;;  %v4159_v52 = vsel %vm5078_vm10, 1.0, %v6788_v1  ;;  %v427_v56 = vsub.f32 %v5090_v40, %v426_v47  ;;  %vm70_vm2 = vcmp.ge.s32.totalorder %v5138_v62, %v4965_v6 }
  0x39   :  { %vm5098_vm12 = vmpackc.low %vm5086_vm9, %vm5078_vm10  ;;  %v4172_v53 = vsel %vm5086_vm9, 1.0, %v6788_v1  ;;  %v439_v57 = vsub.f32 %v5092_v41, %v438_v48  ;;  %v444_v58 = vand.u32 4294901760, %v5116_v49  ;;  %v5132_v59 = vsub.f32 %v4159_v52, %v4159_v52 }
  0x3a   :  { %v6845_v42 = vsel %vm5098_vm12, 4294967295, %v6844_v42  ;;  %4468 = vmatpush1.bf16.msk.msra.mxu0 %vm5098_vm12, %v6791_v23  ;;  %4444 = vmatpush1.bf16.msk.msra.mxu1 %vm5098_vm12, %v6791_v23  ;;  %v4445_v45 = vpack.c.bf16 %v434_v43, %v422_v37  ;;  %v5134_v60 = vsub.f32 %v4172_v53, %v4172_v53  ;;  %v456_v61 = vand.u32 4294901760, %v5118_v51  ;;  %vm5148_vm0 = vmand %vm71_vm13, %vm127_vm14 }
  0x3b   :  { %4470 = vmatprep.subr.bf16.mxu0 %v4469_v36  ;;  %v428_v63 = vand.u32 4294901760, %v427_v56  ;;  %v440_v0 = vand.u32 4294901760, %v439_v57  ;;  %v445_v3 = vsub.f32 %v5116_v49, %v444_v58  ;;  %v450_v4 = vand.u32 4294901760, %v5132_v59 }
  0x3c   :  { %4446 = vmatprep.subr.bf16.mxu1 %v4445_v45  ;;  %v462_v5 = vand.u32 4294901760, %v5134_v60  ;;  %v457_v7 = vsub.f32 %v5118_v51, %v456_v61  ;;  %v6847_v8 = vsel %vm5148_vm0, 4294967295, %v6846_v8  ;;  %v5157_v16 = vpack.c.bf16 %v438_v48, %v426_v47 }
  0x3d   :  { %vm84_vm3 = vcmp.ge.s32.totalorder %v5127_v55, %v4967_v9  ;;  %v5165_v24 = vpack.c.bf16 %v456_v61, %v444_v58  ;;  %v5167_v25 = vpack.c.bf16 %v440_v0, %v428_v63  ;;  %v446_v27 = vand.u32 4294901760, %v445_v3 }
  0x3e   :  { %vm140_vm4 = vcmp.lt.s32.totalorder %v5127_v55, %v4981_v13  ;;  %v451_v28 = vsub.f32 %v5132_v59, %v450_v4  ;;  %v4138_v30 = vsel %vm5148_vm0, 1.0, %v6788_v1  ;;  %vm126_vm5 = vcmp.lt.s32.totalorder %v5138_v62, %v4971_v10 }
  0x3f   :  { %v458_v31 = vand.u32 4294901760, %v457_v7  ;;  %v463_v32 = vsub.f32 %v5134_v60, %v462_v5  ;;  %vm83_vm6 = vcmp.ge.s32.totalorder %v5138_v62, %v4967_v9  ;;  %vm139_vm7 = vcmp.lt.s32.totalorder %v5138_v62, %v4981_v13  ;;  %v4841_v33 = vpop.eup %4840  ;;  %vm5189_vm10 = vmand %vm84_vm3, %vm140_vm4 }
  0x40   :  { %v5184_v35 = vpack.c.bf16 %v462_v5, %v450_v4  ;;  %v6848_v36 = vmov 0  ;;  %vm69_vm9 = vcmp.ge.s32.totalorder %v5155_v15, %v4965_v6  ;;  %vm125_vm13 = vcmp.lt.s32.totalorder %v5155_v15, %v4971_v10  ;;  %vm5206_vm14 = vmand %vm70_vm2, %vm126_vm5 }
  0x41   :  { %v6849_v36 = vsel %vm5189_vm10, 4294967295, %v6848_v36  ;;  %v5198_v37 = vadd.s32 256, %v4962_v2  ;;  %v332_v38 = vsel %vm6780_vm15, %v4841_v33, 0  ;;  %v5201_v39 = vsub.f32 %v4138_v30, %v4138_v30  ;;  %vm5219_vm15 = vmand %vm83_vm6, %vm139_vm7 }
  0x42   :  { %vm82_vm3 = vcmp.ge.s32.totalorder %v5155_v15, %v4967_v9  ;;  %vm138_vm4 = vcmp.lt.s32.totalorder %v5155_v15, %v4981_v13  ;;  %v5214_v44 = vand.u32 4294901760, %v332_v38  ;;  %v452_v45 = vand.u32 4294901760, %v451_v28  ;;  %vm5233_vm12 = vmand %vm69_vm9, %vm125_vm13 }
  0x43   :  { %vm97_vm2 = vcmp.ge.s32.totalorder %v5127_v55, %v4975_v11  ;;  %vm153_vm5 = vcmp.lt.s32.totalorder %v5127_v55, %v4989_v14  ;;  %v464_v47 = vand.u32 4294901760, %v463_v32  ;;  %v4151_v48 = vsel %vm5189_vm10, 1.0, %v6788_v1  ;;  %vm5246_vm10 = vmand %vm82_vm3, %vm138_vm4 }
  0x44   :  { %vm110_vm6 = vcmp.ge.s32.totalorder %v5127_v55, %v4977_v12  ;;  %vm166_vm7 = vcmp.lt.s32.totalorder %v5127_v55, %v5000_v17  ;;  %v5242_v52 = vsub.f32 %v332_v38, %v5214_v44  ;;  %vm68_vm9 = vcmp.ge.s32.totalorder %v5198_v37, %v4965_v6  ;;  %vm5257_vm0 = vmand %vm97_vm2, %vm153_vm5 }
  0x45   :  { %vm124_vm13 = vcmp.lt.s32.totalorder %v5198_v37, %v4971_v10  ;;  %v4449_v56 = vpack.c.bf16 %v458_v31, %v446_v27  ;;  %v4137_v55 = vsel %vm5206_vm14, 1.0, %v6788_v1  ;;  %v6858_v57 = vmov 0  ;;  %vm5270_vm8 = vmand %vm110_vm6, %vm166_vm7 }
  0x46   :  { %v6859_v57 = vsel %vm5257_vm0, 4294967295, %v6858_v57  ;;  %vm137_vm4 = vcmp.lt.s32.totalorder %v5198_v37, %v4981_v13  ;;  %v5266_v58 = vand.u32 4294901760, %v5242_v52  ;;  %v5268_v61 = vsub.f32 %v4151_v48, %v4151_v48  ;;  %vm5281_vm3 = vmand %vm68_vm9, %vm124_vm13 }
  0x47   :  { %v6861_v63 = vmov 0  ;;  %vm152_vm5 = vcmp.lt.s32.totalorder %v5138_v62, %v4989_v14  ;;  %v4451_v0 = vpack.c.bf16 %v464_v47, %v452_v45  ;;  %v4150_v3 = vsel %vm5219_vm15, 1.0, %v6788_v1 }
  0x48   :  { %6860 = vst [vmem:[#allocation11_spill] sm:$0xff] %v5266_v58  ;;  %v6862_v63 = vsel %vm5270_vm8, 4294967295, %v6861_v63  ;;  %vm165_vm7 = vcmp.lt.s32.totalorder %v5138_v62, %v5000_v17  ;;  %695 = vmatmul.mubr.f32.vlgmr.msra.gmra.mrb[0].mxu0 %v5266_v58  ;;  %v410_v5 = vsub.f32 %v5242_v52, %v5266_v58  ;;  %v5292_v7 = vsub.f32 %v4137_v55, %v4137_v55 }
  0x49   :  { %vm6865_vm2 = vcmp.ge.s32.totalorder %v5198_v37, %v4967_v9  ;;  %4472 = vmatpush1.bf16.msra.mxu0 %v5157_v16  ;;  %789 = vmatprep.mubr.f32.mxu0 %v6788_v1  ;;  %v4136_v28 = vsel %vm5233_vm12, 1.0, %v6788_v1  ;;  %v4149_v30 = vsel %vm5246_vm10, 1.0, %v6788_v1  ;;  %v4164_v32 = vsel %vm5257_vm0, 1.0, %v6788_v1 }
  0x4a   :  { %vm5297_vm9 = vmand %vm6865_vm2, %vm137_vm4  ;;  %vm6868_vm4 = vcmp.ge.s32.totalorder %v5138_v62, %v4975_v11  ;;  %4474 = vmatprep.subr.bf16.mxu0 %v5165_v24  ;;  %v5328_v16 = vand.u32 4294901760, %v410_v5  ;;  %v4177_v33 = vsel %vm5270_vm8, 1.0, %v6788_v1  ;;  %v6787_v24 = vand.u32 4294901760, %v5201_v39 }
  0x4b   :  { %vm5319_vm2 = vmand %vm6868_vm4, %vm152_vm5  ;;  %vm6871_vm5 = vcmp.ge.s32.totalorder %v5138_v62, %v4977_v12  ;;  %v5347_v45 = vsub.f32 %v4150_v3, %v4150_v3  ;;  %vm6874_vm13 = vcmp.lt.s32.totalorder %v5155_v15, %v4989_v14  ;;  %vm6875_vm6 = vcmp.ge.s32.totalorder %v5155_v15, %v4975_v11 }
  0x4c   :  { %vm5342_vm4 = vmand %vm6871_vm5, %vm165_vm7  ;;  %v6790_v62 = vand.u32 4294901760, %v5268_v61  ;;  %412 = vmatmul.mubr.f32.vlgmr.msra.gmra.mrb[0].mxu1 %v5328_v16  ;;  %v5365_v48 = vsub.f32 %v4136_v28, %v4136_v28  ;;  %v5367_v55 = vsub.f32 %v4149_v30, %v4149_v30  ;;  %vm107_vm7 = vcmp.ge.s32.totalorder %v5198_v37, %v4977_v12 }
  0x4d   :  { %vm5355_vm8 = vmand %vm6875_vm6, %vm6874_vm13  ;;  %vm6878_vm6 = vcmp.lt.s32.totalorder %v5155_v15, %v5000_v17  ;;  %vm6879_vm13 = vcmp.ge.s32.totalorder %v5155_v15, %v4977_v12  ;;  %vm163_vm5 = vcmp.lt.s32.totalorder %v5198_v37, %v5000_v17  ;;  %4448 = vmatpush1.bf16.msra.mxu1 %v5167_v25  ;;  %4476 = vmatpush1.bf16.msra.mxu0 %v5184_v35  ;;  %v4135_v15 = vsel %vm5281_vm3, 1.0, %v6788_v1 }
  0x4e   :  { %vm5375_vm0 = vmand %vm6879_vm13, %vm6878_vm6  ;;  %v5385_v5 = vsub.f32 %v4164_v32, %v4164_v32  ;;  %v5387_v28 = vsub.f32 %v4177_v33, %v4177_v33  ;;  %v4148_v30 = vsel %vm5297_vm9, 1.0, %v6788_v1  ;;  %4450 = vmatprep.subr.bf16.mxu1 %v4449_v56  ;;  %4478 = vmatprep.subr.msk.bf16.mxu0 %vm5005_vm11, %v6791_v23  ;;  %v4163_v25 = vsel %vm5319_vm2, 1.0, %v6788_v1 }
  0x4f   :  { %v4176_v35 = vsel %vm5342_vm4, 1.0, %v6788_v1  ;;  %v4162_v32 = vsel %vm5355_vm8, 1.0, %v6788_v1  ;;  %v1507_v56 = vsub.f32 %v5201_v39, %v6787_v24  ;;  %vm6882_vm6 = vcmp.lt.s32.totalorder %v5198_v37, %v4989_v14  ;;  %522 = vmatprep.mubr.f32.mxu1 %v6788_v1 }
  0x50   :  { %vm6883_vm11 = vcmp.ge.s32.totalorder %v5198_v37, %v4975_v11  ;;  %v4175_v33 = vsel %vm5375_vm0, 1.0, %v6788_v1  ;;  %v1519_v24 = vsub.f32 %v5268_v61, %v6790_v62  ;;  %791 = vmatmul.mubr.f32.vlgmr.msra.gmra.mrb[0].mxu0 %v5214_v44  ;;  %v5440_v1 = vsub.f32 %v4135_v15, %v4135_v15 }
  0x51   :  { %vm5416_vm13 = vmand %vm6883_vm11, %vm6882_vm6  ;;  %v5442_v19 = vsub.f32 %v4148_v30, %v4148_v30  ;;  %v6796_v62 = vand.u32 4294901760, %v5365_v48  ;;  %v6795_v23 = vand.u32 4294901760, %v5367_v55  ;;  %4452 = vmatpush1.bf16.msra.mxu1 %v4451_v0  ;;  %v6888_v37 = vmov 1.0|1.0   ;;  %869 = vmatprep.mubr.f32.mxu0 %v6891_v26 }
  0x52   :  { %vm5433_vm6 = vmand %vm107_vm7, %vm163_vm5  ;;  %4480 = vmatpush1.bf16.msk.msra.mxu0 %vm5033_vm1, %v6888_v37  ;;  %v5449_v58 = vsub.f32 %v4163_v25, %v4163_v25  ;;  %v5451_v29 = vsub.f32 %v4176_v35, %v4176_v35  ;;  %v5453_v20 = vsub.f32 %v4162_v32, %v4162_v32  ;;  %v6889_v30 = vpack.c.bf16 %v5011_v22, %v5002_v18 }
  0x53   :  { %vm6890_vm7 = vnez %v6839_v34  ;;  %v5462_v0 = vsub.f32 %v4175_v33, %v4175_v33  ;;  %v4161_v25 = vsel %vm5416_vm13, 1.0, %v6891_v26  ;;  %v4174_v35 = vsel %vm5433_vm6, 1.0, %v6891_v26 }
  0x54   :  { %4454 = vmatprep.subr.bf16.mxu1 %v6889_v30  ;;  %4482 = vmatprep.subr.msk.bf16.mxu0 %vm6890_vm7, %v6888_v37  ;;  %vm6892_vm1 = vnez %v6847_v8  ;;  %vm6893_vm5 = vnez %v6849_v36  ;;  %v1508_v22 = vand.u32 4294901760, %v1507_v56  ;;  %v1520_v34 = vand.u32 4294901760, %v1519_v24 }
  0x55   :  { %vm5476_vm11 = vmpackc.low %vm6893_vm5, %vm6892_vm1  ;;  %v6896_v33 = vand.u32 4294901760, %v5292_v7  ;;  %v6897_v15 = vand.u32 4294901760, %v5347_v45  ;;  %524 = vmatmul.mubr.f32.vlgmr.msra.gmra.mrb[0].mxu1 %v5214_v44  ;;  %v964_v8 = vsub.f32 %v5365_v48, %v6796_v62  ;;  %v976_v36 = vsub.f32 %v5367_v55, %v6795_v23 }
  0x56   :  { %v969_v24 = vand.u32 4294901760, %v5440_v1  ;;  %vm6899_vm7 = vnez %v6845_v42  ;;  %vm5505_vm1 = vmpackc.low %vm5219_vm15, %vm5206_vm14  ;;  %v5509_v23 = vsub.f32 %v4161_v25, %v4161_v25  ;;  %v5511_v62 = vsub.f32 %v4174_v35, %v4174_v35  ;;  %610 = vmatprep.mubr.f32.mxu1 %v6891_v26 }
  0x57   :  { %v1513_v30 = vsub.f32 %v5292_v7, %v6896_v33  ;;  %v1525_v32 = vsub.f32 %v5347_v45, %v6897_v15  ;;  %v6898_v33 = vpack.c.bf16 %v5092_v41, %v5090_v40  ;;  %4484 = vmatpush1.bf16.msk.msra.mxu0 %vm6899_vm7, %v6888_v37  ;;  %v1536_v56 = vand.u32 4294901760, %v5449_v58  ;;  %vm5525_vm15 = vmpackc.low %vm5246_vm10, %vm5233_vm12 }
  0x58   :  { %v1548_v40 = vand.u32 4294901760, %v5451_v29  ;;  %v6902_v41 = vpack.c.bf16 %v5118_v51, %v5116_v49  ;;  %4534 = vmatprep.subr.msk.bf16.mxu0 %vm5476_vm11, %v6888_v37  ;;  %v6905_v43 = vand.u32 4294901760, %v5385_v5  ;;  %v6906_v25 = vand.u32 4294901760, %v5387_v28  ;;  %vm5563_vm5 = vmpackc.low %vm5297_vm9, %vm5281_vm3 }
  0x59   :  { %4456 = vmatpush1.bf16.msra.mxu1 %v6898_v33  ;;  %vm6907_vm14 = vnez %v6859_v57  ;;  %vm6908_vm12 = vnez %v6862_v63  ;;  %v4541_v54 = vpack.c.bf16 %v1520_v34, %v1508_v22  ;;  %v1514_v33 = vand.u32 4294901760, %v1513_v30  ;;  %vm5585_vm3 = vmpackc.low %vm5342_vm4, %vm5319_vm2 }
  0x5a   :  { %4458 = vmatprep.subr.bf16.mxu1 %v6902_v41  ;;  %v1531_v46 = vsub.f32 %v5385_v5, %v6905_v43  ;;  %v1543_v49 = vsub.f32 %v5387_v28, %v6906_v25  ;;  %vm5542_vm10 = vmpackc.low %vm6908_vm12, %vm6907_vm14  ;;  %v1526_v41 = vand.u32 4294901760, %v1525_v32  ;;  %871 = vmatmul.mubr.f32.vlgmr.msra.gmra.mrb[0].mxu0 %v5214_v44  ;;  %v965_v43 = vand.u32 4294901760, %v964_v8 }
  0x5b   :  { %v977_v25 = vand.u32 4294901760, %v976_v36  ;;  %v970_v35 = vsub.f32 %v5440_v1, %v969_v24  ;;  %v6911_v51 = vand.u32 4294901760, %v5442_v19  ;;  %v6912_v63 = vpack.c.bf16 %v5134_v60, %v5132_v59  ;;  %4536 = vmatpush1.bf16.msk.msra.mxu0 %vm5505_vm1, %v6888_v37  ;;  %1492 = vmatprep.mubr.f32.mxu0 %v6891_v26  ;;  %vm5600_vm9 = vmpackc.low %vm5375_vm0, %vm5355_vm8 }
  0x5c   :  { %v6913_v32 = vmov 0  ;;  %v1537_v22 = vsub.f32 %v5449_v58, %v1536_v56  ;;  %v1549_v59 = vsub.f32 %v5451_v29, %v1548_v40  ;;  %v993_v60 = vand.u32 4294901760, %v5509_v23  ;;  %4538 = vmatprep.subr.msk.bf16.mxu0 %vm5542_vm10, %v6888_v37  ;;  %vm5624_vm8 = vmpackc.low %vm5433_vm6, %vm5416_vm13 }
  0x5d   :  { %v982_v57 = vsub.f32 %v5442_v19, %v6911_v51  ;;  %4460 = vmatpush1.bf16.msra.mxu1 %v6912_v63  ;;  %v6914_v32 = vsel %vm5563_vm5, 4294967295, %v6913_v32  ;;  %v6797_v34 = vand.u32 4294901760, %v5511_v62  ;;  %v6915_v4 = vmov 0 }
  0x5e   :  { %4486 = vmatprep.subr.msk.bf16.mxu1 %vm5525_vm15, %v6888_v37  ;;  %v6916_v4 = vsel %vm5585_vm3, 4294967295, %v6915_v4  ;;  %v1532_v27 = vand.u32 4294901760, %v1531_v46  ;;  %v1544_v30 = vand.u32 4294901760, %v1543_v49  ;;  %v6917_v8 = vand.u32 4294901760, %v5453_v20 }
  0x5f   :  { %v6918_v51 = vand.u32 4294901760, %v5462_v0  ;;  %v6919_v31 = vmov 0  ;;  %v4543_v38 = vpack.c.bf16 %v1526_v41, %v1514_v33  ;;  %v971_v46 = vand.u32 4294901760, %v970_v35  ;;  %4540 = vmatpush1.bf16.msk.msra.mxu0 %vm5585_vm3, %v6888_v37 }
  0x60   :  { %v988_v36 = vsub.f32 %v5453_v20, %v6917_v8  ;;  %v6920_v31 = vsel %vm5600_vm9, 4294967295, %v6919_v31  ;;  %613 = vmatmul.mubr.f32.vlgmr.msra.gmra.mrb[0].mxu1 %v5242_v52  ;;  %v983_v49 = vand.u32 4294901760, %v982_v57  ;;  %v1538_v47 = vand.u32 4294901760, %v1537_v22  ;;  %4542 = vmatprep.subr.bf16.mxu0 %v4541_v54 }
  0x61   :  { %v1000_v63 = vsub.f32 %v5462_v0, %v6918_v51  ;;  %4488 = vmatpush1.bf16.msk.msra.mxu1 %vm5563_vm5, %v6888_v37  ;;  %v1550_v8 = vand.u32 4294901760, %v1549_v59  ;;  %v994_v3 = vsub.f32 %v5509_v23, %v993_v60  ;;  %v1006_v33 = vsub.f32 %v5511_v62, %v6797_v34  ;;  %949 = vmatprep.mubr.f32.mxu1 %v6891_v26 }
  0x62   :  { %4490 = vmatprep.subr.msk.bf16.mxu1 %vm5600_vm9, %v6888_v37  ;;  %v6921_v35 = vmov 0  ;;  %v4493_v41 = vpack.c.bf16 %v977_v25, %v965_v43  ;;  %v4545_v57 = vpack.c.bf16 %v1544_v30, %v1532_v27  ;;  %v989_v22 = vand.u32 4294901760, %v988_v36  ;;  %1498 = vmatmul.mubr.f32.vlgmr.msra.gmra.mrb[2].mxu0 %v5328_v16 }
  0x63   :  { %v6922_v35 = vsel %vm5624_vm8, 4294967295, %v6921_v35  ;;  %v1001_v59 = vand.u32 4294901760, %v1000_v63  ;;  %4544 = vmatpush1.bf16.msra.mxu0 %v4543_v38  ;;  %v4495_v21 = vpack.c.bf16 %v983_v49, %v971_v46  ;;  %v4547_v54 = vpack.c.bf16 %v1550_v8, %v1538_v47  ;;  %1608 = vmatprep.mubr.f32.mxu0 %v6891_v26 }
  0x64   :  { %v995_v53 = vand.u32 4294901760, %v994_v3  ;;  %v1007_v51 = vand.u32 4294901760, %v1006_v33  ;;  %4546 = vmatprep.subr.bf16.mxu0 %v4545_v57  ;;  %v4549_v43 = vpack.c.bf16 %v5268_v61, %v5201_v39  ;;  %v4551_v27 = vpack.c.bf16 %v5347_v45, %v5292_v7 }
  0x65   :  { %4492 = vmatpush1.bf16.msk.msra.mxu1 %vm5624_vm8, %v6888_v37  ;;  %v4497_v34 = vpack.c.bf16 %v1001_v59, %v989_v22  ;;  %v4501_v30 = vpack.c.bf16 %v5367_v55, %v5365_v48  ;;  %v4553_v36 = vpack.c.bf16 %v5387_v28, %v5385_v5  ;;  %v5646_v63 = vadd.s32 1152, %v4962_v2 }
  0x66   :  { %4494 = vmatprep.subr.bf16.mxu1 %v4493_v41  ;;  %v4499_v25 = vpack.c.bf16 %v1007_v51, %v995_v53  ;;  %v4503_v38 = vpack.c.bf16 %v5442_v19, %v5440_v1  ;;  %v4505_v46 = vpack.c.bf16 %v5462_v0, %v5453_v20  ;;  %v5655_v49 = vadd.s32 1024, %v4962_v2 }
  0x67   :  { %4548 = vmatpush1.bf16.msra.mxu0 %v4547_v54  ;;  %vm75_vm0 = vcmp.ge.s32.totalorder %v5646_v63, %v4965_v6  ;;  %vm131_vm2 = vcmp.lt.s32.totalorder %v5646_v63, %v4971_v10  ;;  %v5664_v47 = vadd.s32 896, %v4962_v2  ;;  %v4507_v8 = vpack.c.bf16 %v5511_v62, %v5509_v23  ;;  %v6964_v23 = vld [vmem:[#allocation11_spill] sm:$0xff] }
  0x68   :  { %955 = vmatmul.mubr.f32.vlgmr.msra.gmra.mrb[2].mxu1 %v5328_v16  ;;  %4550 = vmatprep.subr.bf16.mxu0 %v4549_v43  ;;  %vm88_vm4 = vcmp.ge.s32.totalorder %v5646_v63, %v4967_v9  ;;  %vm144_vm13 = vcmp.lt.s32.totalorder %v5646_v63, %v4981_v13  ;;  %vm130_vm7 = vcmp.lt.s32.totalorder %v5655_v49, %v4971_v10  ;;  %vm5680_vm14 = vmand %vm75_vm0, %vm131_vm2  ;;  %v6923_v3 = vmov 0 }
  0x69   :  { %4496 = vmatpush1.bf16.msra.mxu1 %v4495_v21  ;;  %1065 = vmatprep.mubr.f32.mxu1 %v6891_v26  ;;  %v6924_v3 = vsel %vm5680_vm14, 4294967295, %v6923_v3  ;;  %vm87_vm12 = vcmp.ge.s32.totalorder %v5655_v49, %v4967_v9  ;;  %vm143_vm8 = vcmp.lt.s32.totalorder %v5655_v49, %v4981_v13  ;;  %v6925_v33 = vand.u32 4294901760, %v5201_v39  ;;  %vm5693_vm6 = vmand %vm88_vm4, %vm144_vm13 }
  0x6a   :  { %4498 = vmatprep.subr.bf16.mxu1 %v4497_v34  ;;  %1610 = vmatmul.mubr.f32.vlgmr.msra.gmra.mrb[2].mxu0 %v5214_v44  ;;  %v4555_v34 = vpack.c.bf16 %v5451_v29, %v5449_v58  ;;  %v6926_v41 = vand.u32 4294901760, %v5268_v61  ;;  %v6927_v22 = vmov 0  ;;  %v5702_v59 = vadd.s32 768, %v4962_v2 }
  0x6b   :  { %4552 = vmatpush1.bf16.msra.mxu0 %v4551_v27  ;;  %1696 = vmatprep.mubr.f32.mxu0 %v6891_v26  ;;  %v6928_v22 = vsel %vm5693_vm6, 4294967295, %v6927_v22  ;;  %v6929_v39 = vand.u32 4294901760, %v5292_v7  ;;  %v6930_v61 = vand.u32 4294901760, %v5347_v45  ;;  %vm6931_vm4 = vcmp.ge.s32.totalorder %v5655_v49, %v4965_v6 }
  0x6c   :  { %4554 = vmatprep.subr.bf16.mxu0 %v4553_v36  ;;  %v4565_v57 = vpack.c.bf16 %v6926_v41, %v6925_v33  ;;  %vm5714_vm13 = vmand %vm6931_vm4, %vm130_vm7  ;;  %v6932_v54 = vmov 0  ;;  %v6934_v7 = vand.u32 4294901760, %v5365_v48  ;;  %v6935_v45 = vand.u32 4294901760, %v5367_v55 }
  0x6d   :  { %4500 = vmatpush1.bf16.msra.mxu1 %v4499_v25  ;;  %v4567_v21 = vpack.c.bf16 %v6930_v61, %v6929_v39  ;;  %v6933_v54 = vsel %vm5714_vm13, 4294967295, %v6932_v54  ;;  %v4142_v51 = vsel %vm5680_vm14, 1.0, %v6891_v26  ;;  %vm5741_vm7 = vmand %vm87_vm12, %vm143_vm8  ;;  %v6938_v48 = vand.u32 4294901760, %v5385_v5 }
  0x6e   :  { %4502 = vmatprep.subr.bf16.mxu1 %v4501_v30  ;;  %v4517_v53 = vpack.c.bf16 %v6935_v45, %v6934_v7  ;;  %v6939_v55 = vand.u32 4294901760, %v5387_v28  ;;  %v4155_v27 = vsel %vm5693_vm6, 1.0, %v6891_v26  ;;  %vm6940_vm8 = vcmp.lt.s32.totalorder %v5664_v47, %v4971_v10 }
  0x6f   :  { %4556 = vmatpush1.bf16.msra.mxu0 %v4555_v34  ;;  %vm6941_vm12 = vcmp.ge.s32.totalorder %v5664_v47, %v4965_v6  ;;  %v6944_v5 = vand.u32 4294901760, %v5442_v19  ;;  %v4571_v36 = vpack.c.bf16 %v1548_v40, %v1536_v56  ;;  %v5800_v1 = vsub.f32 %v4142_v51, %v4142_v51 }
  0x70   :  { %1067 = vmatmul.mubr.f32.vlgmr.msra.gmra.mrb[2].mxu1 %v5214_v44  ;;  %4558 = vmatprep.subr.msk.bf16.mxu0 %vm5476_vm11, %v6888_v37  ;;  %v4569_v25 = vpack.c.bf16 %v6939_v55, %v6938_v48  ;;  %vm5763_vm4 = vmand %vm6941_vm12, %vm6940_vm8  ;;  %vm6945_vm8 = vcmp.lt.s32.totalorder %v5664_v47, %v4981_v13  ;;  %vm6946_vm12 = vcmp.ge.s32.totalorder %v5664_v47, %v4967_v9  ;;  %v6951_v19 = vmov 0 }
  0x71   :  { %4504 = vmatpush1.bf16.msra.mxu1 %v4503_v38  ;;  %1153 = vmatprep.mubr.f32.mxu1 %v6891_v26  ;;  %v4519_v28 = vpack.c.bf16 %v6944_v5, %v969_v24  ;;  %vm5786_vm0 = vmand %vm6946_vm12, %vm6945_vm8  ;;  %v6947_v38 = vmov 0  ;;  %vm6949_vm8 = vcmp.lt.s32.totalorder %v5646_v63, %v4989_v14  ;;  %vm6950_vm12 = vcmp.ge.s32.totalorder %v5646_v63, %v4975_v11 }
  0x72   :  { %4506 = vmatprep.subr.bf16.mxu1 %v4505_v46  ;;  %1699 = vmatmul.mubr.f32.vlgmr.msra.gmra.mrb[2].mxu0 %v5242_v52  ;;  %v6948_v38 = vsel %vm5786_vm0, 4294967295, %v6947_v38  ;;  %vm5808_vm2 = vmand %vm6950_vm12, %vm6949_vm8  ;;  %v5819_v29 = vsub.f32 %v4155_v27, %v4155_v27  ;;  %vm6954_vm8 = vcmp.ge.s32.totalorder %v5646_v63, %v4977_v12  ;;  %v6955_v58 = vmov 0 }
  0x73   :  { %4560 = vmatpush1.bf16.msk.msra.mxu0 %vm5505_vm1, %v6888_v37  ;;  %1777 = vmatprep.mubr.f32.mxu0 %v6891_v26  ;;  %v6952_v19 = vsel %vm5808_vm2, 4294967295, %v6951_v19  ;;  %v6957_v24 = vand.u32 4294901760, %v5453_v20  ;;  %v6958_v56 = vand.u32 4294901760, %v5462_v0  ;;  %v4141_v20 = vsel %vm5714_vm13, 1.0, %v6891_v26 }
  0x74   :  { %4562 = vmatprep.subr.msk.bf16.mxu0 %vm5542_vm10, %v6888_v37  ;;  %vm6969_vm14 = vnez %v6922_v35  ;;  %v4168_v41 = vsel %vm5808_vm2, 1.0, %v6891_v26  ;;  %v6810_v61 = vand.u32 4294901760, %v5800_v1  ;;  %v5921_v7 = vsub.f32 %v4141_v20, %v4141_v20 }
  0x75   :  { %4508 = vmatpush1.bf16.msra.mxu1 %v4507_v8  ;;  %v4521_v40 = vpack.c.bf16 %v6958_v56, %v6957_v24  ;;  %v4153_v8 = vsel %vm5786_vm0, 1.0, %v6891_v26  ;;  %vm6982_vm0 = vcmp.lt.s32.totalorder %v5664_v47, %v5000_v17  ;;  %vm167_vm2 = vcmp.lt.s32.totalorder %v5702_v59, %v5000_v17 }
  0x76   :  { %4510 = vmatprep.subr.msk.bf16.mxu1 %vm5525_vm15, %v6888_v37  ;;  %v5942_v51 = vsub.f32 %v4153_v8, %v4153_v8  ;;  %v5958_v55 = vsub.f32 %v4168_v41, %v4168_v41  ;;  %v6814_v20 = vand.u32 4294901760, %v5921_v7  ;;  %v7007_v30 = vmov 0 }
  0x77   :  { %4564 = vmatpush1.bf16.msk.msra.mxu0 %vm5585_vm3, %v6888_v37  ;;  %vm6953_vm3 = vcmp.lt.s32.totalorder %v5646_v63, %v5000_v17  ;;  %v6959_v63 = vand.u32 4294901760, %v5511_v62  ;;  %v4154_v62 = vsel %vm5741_vm7, 1.0, %v6891_v26  ;;  %v7013_v46 = vmov 0 }
  0x78   :  { %1156 = vmatmul.mubr.f32.vlgmr.msra.gmra.mrb[2].mxu1 %v5242_v52  ;;  %4566 = vmatprep.subr.bf16.mxu0 %v4565_v57  ;;  %vm5827_vm12 = vmand %vm6954_vm8, %vm6953_vm3  ;;  %vm6960_vm3 = vcmp.lt.s32.totalorder %v5702_v59, %v4971_v10  ;;  %vm6961_vm8 = vcmp.ge.s32.totalorder %v5702_v59, %v4965_v6  ;;  %v5923_v45 = vsub.f32 %v4154_v62, %v4154_v62  ;;  %v7016_v33 = vmov 0 }
  0x79   :  { %4512 = vmatpush1.bf16.msk.msra.mxu1 %vm5563_vm5, %v6888_v37  ;;  %v6956_v58 = vsel %vm5827_vm12, 4294967295, %v6955_v58  ;;  %1234 = vmatprep.mubr.f32.mxu1 %v6891_v26  ;;  %v4523_v34 = vpack.c.bf16 %v6959_v63, %v993_v60  ;;  %vm5850_vm6 = vmand %vm6961_vm8, %vm6960_vm3  ;;  %vm6965_vm3 = vcmp.lt.s32.totalorder %v5702_v59, %v4981_v13  ;;  %vm6966_vm8 = vcmp.ge.s32.totalorder %v5702_v59, %v4967_v9 }
  0x7a   :  { %4514 = vmatprep.subr.msk.bf16.mxu1 %vm5600_vm9, %v6888_v37  ;;  %1781 = vmatmul.mubr.f32.vlgmr.msra.gmra.mrb[2].mxu0 %v6964_v23  ;;  %vm5871_vm5 = vmand %vm6966_vm8, %vm6965_vm3  ;;  %v4140_v60 = vsel %vm5763_vm4, 1.0, %v6891_v26  ;;  %vm6970_vm3 = vcmp.lt.s32.totalorder %v5655_v49, %v4989_v14  ;;  %vm6971_vm8 = vcmp.ge.s32.totalorder %v5655_v49, %v4975_v11  ;;  %v4181_v57 = vsel %vm5827_vm12, 1.0, %v6891_v26 }
  0x7b   :  { %4568 = vmatpush1.bf16.msra.mxu0 %v4567_v21  ;;  %vm5894_vm9 = vmand %vm6971_vm8, %vm6970_vm3  ;;  %vm6974_vm3 = vcmp.lt.s32.totalorder %v5655_v49, %v5000_v17  ;;  %vm6975_vm8 = vcmp.ge.s32.totalorder %v5655_v49, %v4977_v12  ;;  %v6809_v21 = vand.u32 4294901760, %v5819_v29  ;;  %1875 = vmatprep.mubr.f32.mxu0 %v6891_v26  ;;  %vm6979_vm12 = vcmp.ge.s32.totalorder %v5664_v47, %v4975_v11 }
  0x7c   :  { %4570 = vmatprep.subr.bf16.mxu0 %v4569_v25  ;;  %vm5914_vm13 = vmand %vm6975_vm8, %vm6974_vm3  ;;  %vm111_vm8 = vcmp.ge.s32.totalorder %v5702_v59, %v4977_v12  ;;  %v5960_v25 = vsub.f32 %v4181_v57, %v4181_v57  ;;  %v4152_v27 = vsel %vm5871_vm5, 1.0, %v6891_v26  ;;  %v4167_v5 = vsel %vm5894_vm9, 1.0, %v6891_v26 }
  0x7d   :  { %4516 = vmatpush1.bf16.msk.msra.mxu1 %vm6969_vm14, %v6888_v37  ;;  %vm6978_vm14 = vcmp.lt.s32.totalorder %v5664_v47, %v4989_v14  ;;  %v2605_v24 = vsub.f32 %v5819_v29, %v6809_v21  ;;  %v6813_v62 = vand.u32 4294901760, %v5923_v45  ;;  %v6015_v8 = vsub.f32 %v4152_v27, %v4152_v27 }
  0x7e   :  { %4518 = vmatprep.subr.bf16.mxu1 %v4517_v53  ;;  %vm5931_vm3 = vmand %vm6979_vm12, %vm6978_vm14  ;;  %v5940_v53 = vsub.f32 %v4140_v60, %v4140_v60  ;;  %vm6983_vm14 = vcmp.ge.s32.totalorder %v5664_v47, %v4977_v12  ;;  %v4139_v47 = vsel %vm5850_vm6, 1.0, %v6891_v26  ;;  %v6812_v57 = vand.u32 4294901760, %v5942_v51 }
  0x7f   :  { %vm5950_vm12 = vmand %vm6983_vm14, %vm6982_vm0  ;;  %4572 = vmatpush1.bf16.msra.mxu0 %v4571_v36  ;;  %v2593_v36 = vsub.f32 %v5800_v1, %v6810_v61  ;;  %vm6986_vm0 = vcmp.lt.s32.totalorder %v5702_v59, %v4989_v14  ;;  %v4166_v56 = vsel %vm5931_vm3, 1.0, %v6891_v26  ;;  %v6013_v60 = vsub.f32 %v4139_v47, %v4139_v47 }
  0x80   :  { %1238 = vmatmul.mubr.f32.vlgmr.msra.gmra.mrb[2].mxu1 %v6964_v23  ;;  %4574 = vmatprep.subr.msk.bf16.mxu0 %vm5476_vm11, %v6888_v37  ;;  %vm6987_vm11 = vcmp.ge.s32.totalorder %v5702_v59, %v4975_v11  ;;  %v6811_v41 = vand.u32 4294901760, %v5940_v53  ;;  %v6022_v59 = vsub.f32 %v4167_v5, %v4167_v5  ;;  %v6815_v61 = vand.u32 4294901760, %v5958_v55 }
  0x81   :  { %4520 = vmatpush1.bf16.msra.mxu1 %v4519_v28  ;;  %v4180_v28 = vsel %vm5914_vm13, 1.0, %v6891_v26  ;;  %vm5989_vm14 = vmand %vm6987_vm11, %vm6986_vm0  ;;  %1332 = vmatprep.mubr.f32.mxu1 %v6891_v26  ;;  %v6816_v47 = vand.u32 4294901760, %v5960_v25  ;;  %v2594_v50 = vand.u32 4294901760, %v2593_v36  ;;  %v2055_v36 = vand.u32 4294901760, %v6013_v60 }
  0x82   :  { %4522 = vmatprep.subr.bf16.mxu1 %v4521_v40  ;;  %v4179_v40 = vsel %vm5950_vm12, 1.0, %v6891_v26  ;;  %vm6006_vm0 = vmand %vm111_vm8, %vm167_vm2  ;;  %1877 = vmatmul.mubr.f32.vlgmr.msra.gmra.mrb[2].mxu0 %v5214_v44  ;;  %v6024_v21 = vsub.f32 %v4180_v28, %v4180_v28  ;;  %v4165_v27 = vsel %vm5989_vm14, 1.0, %v6891_v26  ;;  %v2606_v28 = vand.u32 4294901760, %v2605_v24 }
  0x83   :  { %4576 = vmatpush1.bf16.msk.msra.mxu0 %vm5505_vm1, %v6888_v37  ;;  %v6036_v15 = vsub.f32 %v4179_v40, %v4179_v40  ;;  %v4178_v5 = vsel %vm6006_vm0, 1.0, %v6891_v26  ;;  %1955 = vmatprep.mubr.f32.mxu0 %v6891_v26  ;;  %vm6992_vm1 = vnez %v6924_v3  ;;  %v2611_v40 = vsub.f32 %v5923_v45, %v6813_v62 }
  0x84   :  { %4578 = vmatprep.subr.msk.bf16.mxu0 %vm5542_vm10, %v6888_v37  ;;  %v2050_v3 = vsub.f32 %v5940_v53, %v6811_v41  ;;  %v2067_v24 = vand.u32 4294901760, %v6015_v8  ;;  %vm6996_vm10 = vnez %v6914_v32  ;;  %vm6997_vm8 = vnez %v6916_v4 }
  0x85   :  { %4524 = vmatpush1.bf16.msra.mxu1 %v4523_v34  ;;  %v6034_v34 = vsub.f32 %v4166_v56, %v4166_v56  ;;  %v2599_v56 = vsub.f32 %v5921_v7, %v6814_v20  ;;  %vm6998_vm11 = vnez %v6933_v54  ;;  %v6084_v62 = vsub.f32 %v4178_v5, %v4178_v5 }
  0x86   :  { %4526 = vmatprep.subr.msk.bf16.mxu1 %vm5525_vm15, %v6888_v37  ;;  %vm6993_vm15 = vnez %v6928_v22  ;;  %v2062_v22 = vsub.f32 %v5942_v51, %v6812_v57  ;;  %v6082_v57 = vsub.f32 %v4165_v27, %v4165_v27  ;;  %v6817_v20 = vand.u32 4294901760, %v6022_v59 }
  0x87   :  { %vm6049_vm2 = vmpackc.low %vm6993_vm15, %vm6992_vm1  ;;  %4580 = vmatpush1.bf16.msk.msra.mxu0 %vm6997_vm8, %v6888_v37  ;;  %vm7001_vm15 = vnez %v6920_v31  ;;  %v7003_v4 = vmov 0  ;;  %v2617_v54 = vsub.f32 %v5958_v55, %v6815_v61  ;;  %v2629_v31 = vsub.f32 %v5960_v25, %v6816_v47 }
  0x88   :  { %1334 = vmatmul.mubr.f32.vlgmr.msra.gmra.mrb[2].mxu1 %v5214_v44  ;;  %vm6078_vm1 = vmpackc.low %vm5741_vm7, %vm6998_vm11  ;;  %4630 = vmatprep.subr.msk.bf16.mxu0 %vm6049_vm2, %v6888_v37  ;;  %vm7002_vm7 = vnez %v6948_v38  ;;  %v2073_v43 = vand.u32 4294901760, %v6034_v34  ;;  %vm7005_vm8 = vnez %v6952_v19  ;;  %v4637_v38 = vpack.c.bf16 %v2606_v28, %v2594_v50 }
  0x89   :  { %4528 = vmatpush1.bf16.msk.msra.mxu1 %vm6996_vm10, %v6888_v37  ;;  %vm6098_vm10 = vmpackc.low %vm7002_vm7, %vm5763_vm4  ;;  %1412 = vmatprep.mubr.f32.mxu1 %v6891_v26  ;;  %vm7006_vm4 = vnez %v6956_v58  ;;  %v2600_v5 = vand.u32 4294901760, %v2599_v56  ;;  %v2612_v61 = vand.u32 4294901760, %v2611_v40  ;;  %v2051_v47 = vand.u32 4294901760, %v2050_v3 }
  0x8a   :  { %4530 = vmatprep.subr.msk.bf16.mxu1 %vm7001_vm15, %v6888_v37  ;;  %v7004_v4 = vsel %vm6098_vm10, 4294967295, %v7003_v4  ;;  %vm6115_vm11 = vmpackc.low %vm7006_vm4, %vm7005_vm8  ;;  %1957 = vmatmul.mubr.f32.vlgmr.msra.gmra.mrb[2].mxu0 %v5214_v44  ;;  %v2063_v32 = vand.u32 4294901760, %v2062_v22  ;;  %v2056_v27 = vsub.f32 %v6013_v60, %v2055_v36  ;;  %v2068_v19 = vsub.f32 %v6015_v8, %v2067_v24 }
  0x8b   :  { %v7008_v30 = vsel %vm6115_vm11, 4294967295, %v7007_v30  ;;  %vm7009_vm15 = vnez %v6922_v35  ;;  %4632 = vmatpush1.bf16.msk.msra.mxu0 %vm6078_vm1, %v6888_v37  ;;  %vm6136_vm7 = vmpackc.low %vm5871_vm5, %vm5850_vm6  ;;  %v2623_v50 = vsub.f32 %v6022_v59, %v6817_v20  ;;  %v7012_v28 = vand.u32 4294901760, %v6024_v21  ;;  %2578 = vmatprep.mubr.f32.mxu0 %v6891_v26 }
  0x8c   :  { %v6819_v56 = vand.u32 4294901760, %v6082_v57  ;;  %v6818_v40 = vand.u32 4294901760, %v6084_v62  ;;  %4634 = vmatprep.subr.msk.bf16.mxu0 %vm6115_vm11, %v6888_v37  ;;  %vm6158_vm5 = vmpackc.low %vm5914_vm13, %vm5894_vm9  ;;  %v2618_v0 = vand.u32 4294901760, %v2617_v54  ;;  %v2630_v3 = vand.u32 4294901760, %v2629_v31 }
  0x8d   :  { %4532 = vmatpush1.bf16.msk.msra.mxu1 %vm7009_vm15, %v6888_v37  ;;  %v2635_v35 = vsub.f32 %v6024_v21, %v7012_v28  ;;  %v7014_v46 = vsel %vm6158_vm5, 4294967295, %v7013_v46  ;;  %v2074_v22 = vsub.f32 %v6034_v34, %v2073_v43  ;;  %v7015_v28 = vand.u32 4294901760, %v6036_v15  ;;  %vm6173_vm9 = vmpackc.low %vm5950_vm12, %vm5931_vm3 }
  0x8e   :  { %4582 = vmatprep.subr.msk.bf16.mxu1 %vm6098_vm10, %v6888_v37  ;;  %v7017_v33 = vsel %vm6173_vm9, 4294967295, %v7016_v33  ;;  %v4639_v39 = vpack.c.bf16 %v2612_v61, %v2600_v5  ;;  %v2057_v54 = vand.u32 4294901760, %v2056_v27  ;;  %v2069_v31 = vand.u32 4294901760, %v2068_v19  ;;  %vm6197_vm6 = vmpackc.low %vm6006_vm0, %vm5989_vm14 }
  0x8f   :  { %v2086_v20 = vsub.f32 %v6036_v15, %v7015_v28  ;;  %4636 = vmatpush1.bf16.msk.msra.mxu0 %vm6158_vm5, %v6888_v37  ;;  %v2624_v49 = vand.u32 4294901760, %v2623_v50  ;;  %v2636_v28 = vand.u32 4294901760, %v2635_v35  ;;  %v2080_v48 = vsub.f32 %v6082_v57, %v6819_v56 }
  0x90   :  { %1414 = vmatmul.mubr.f32.vlgmr.msra.gmra.mrb[2].mxu1 %v5214_v44  ;;  %v2092_v61 = vsub.f32 %v6084_v62, %v6818_v40  ;;  %4638 = vmatprep.subr.bf16.mxu0 %v4637_v38  ;;  %v7018_v27 = vmov 0  ;;  %v4589_v5 = vpack.c.bf16 %v2063_v32, %v2051_v47  ;;  %v4641_v19 = vpack.c.bf16 %v2630_v3, %v2618_v0 }
  0x91   :  { %4584 = vmatpush1.bf16.msk.msra.mxu1 %vm6136_vm7, %v6888_v37  ;;  %v7019_v27 = vsel %vm6197_vm6, 4294967295, %v7018_v27  ;;  %v2075_v50 = vand.u32 4294901760, %v2074_v22  ;;  %v2087_v35 = vand.u32 4294901760, %v2086_v20  ;;  %2035 = vmatprep.mubr.f32.mxu1 %v6891_v26  ;;  %v4591_v18 = vpack.c.bf16 %v2069_v31, %v2057_v54 }
  0x92   :  { %4586 = vmatprep.subr.msk.bf16.mxu1 %vm6173_vm9, %v6888_v37  ;;  %2584 = vmatmul.mubr.f32.vlgmr.msra.gmra.mrb[4].mxu0 %v5328_v16  ;;  %v4643_v38 = vpack.c.bf16 %v2636_v28, %v2624_v49  ;;  %v2081_v63 = vand.u32 4294901760, %v2080_v48  ;;  %v2093_v40 = vand.u32 4294901760, %v2092_v61  ;;  %v4645_v47 = vpack.c.bf16 %v5819_v29, %v5800_v1 }
  0x93   :  { %4640 = vmatpush1.bf16.msra.mxu0 %v4639_v39  ;;  %v4593_v56 = vpack.c.bf16 %v2087_v35, %v2075_v50  ;;  %2694 = vmatprep.mubr.f32.mxu0 %v6891_v26  ;;  %v4647_v32 = vpack.c.bf16 %v5923_v45, %v5921_v7  ;;  %v4597_v0 = vpack.c.bf16 %v5942_v51, %v5940_v53  ;;  %v6227_v39 = vadd.s32 1536, %v4962_v2 }
  0x94   :  { %4642 = vmatprep.subr.bf16.mxu0 %v4641_v19  ;;  %v4595_v20 = vpack.c.bf16 %v2093_v40, %v2081_v63  ;;  %v4649_v3 = vpack.c.bf16 %v5960_v25, %v5958_v55  ;;  %v4599_v40 = vpack.c.bf16 %v6015_v8, %v6013_v60  ;;  %v4651_v22 = vpack.c.bf16 %v6024_v21, %v6022_v59  ;;  %v4089_v60 = vld [vmem:[#allocation5 + $0x60] sm:$0xff] }
  0x95   :  { %4588 = vmatpush1.bf16.msk.msra.mxu1 %vm6197_vm6, %v6888_v37  ;;  %v4603_v54 = vpack.c.bf16 %v6084_v62, %v6082_v57  ;;  %v6235_v31 = vadd.s32 1408, %v4962_v2  ;;  %vm78_vm13 = vcmp.ge.s32.totalorder %v6227_v39, %v4965_v6  ;;  %vm134_vm3 = vcmp.lt.s32.totalorder %v6227_v39, %v4971_v10 }
  0x96   :  { %4590 = vmatprep.subr.bf16.mxu1 %v4589_v5  ;;  %v6244_v49 = vadd.s32 1280, %v4962_v2  ;;  %vm91_vm12 = vcmp.ge.s32.totalorder %v6227_v39, %v4967_v9  ;;  %vm147_vm14 = vcmp.lt.s32.totalorder %v6227_v39, %v4981_v13  ;;  %v7020_v2 = vand.u32 4294901760, %v5800_v1  ;;  %vm6268_vm4 = vmand %vm78_vm13, %vm134_vm3 }
  0x97   :  { %4644 = vmatpush1.bf16.msra.mxu0 %v4643_v38  ;;  %v7021_v28 = vand.u32 4294901760, %v5819_v29  ;;  %vm77_vm0 = vcmp.ge.s32.totalorder %v6235_v31, %v4965_v6  ;;  %vm133_vm8 = vcmp.lt.s32.totalorder %v6235_v31, %v4971_v10  ;;  %vm90_vm15 = vcmp.ge.s32.totalorder %v6235_v31, %v4967_v9 }
  0x98   :  { %2041 = vmatmul.mubr.f32.vlgmr.msra.gmra.mrb[4].mxu1 %v5328_v16  ;;  %4646 = vmatprep.subr.bf16.mxu0 %v4645_v47  ;;  %v7024_v1 = vand.u32 4294901760, %v5921_v7  ;;  %v7025_v29 = vand.u32 4294901760, %v5923_v45  ;;  %vm132_vm3 = vcmp.lt.s32.totalorder %v6244_v49, %v4971_v10  ;;  %v7028_v7 = vand.u32 4294901760, %v5940_v53 }
  0x99   :  { %4592 = vmatpush1.bf16.msra.mxu1 %v4591_v18  ;;  %2151 = vmatprep.mubr.f32.mxu1 %v6891_v26  ;;  %v4661_v48 = vpack.c.bf16 %v7021_v28, %v7020_v2  ;;  %v7029_v45 = vand.u32 4294901760, %v5942_v51  ;;  %vm145_vm13 = vcmp.lt.s32.totalorder %v6244_v49, %v4981_v13  ;;  %v7032_v10 = vand.u32 4294901760, %v5958_v55 }
  0x9a   :  { %4594 = vmatprep.subr.bf16.mxu1 %v4593_v56  ;;  %2696 = vmatmul.mubr.f32.vlgmr.msra.gmra.mrb[4].mxu0 %v5214_v44  ;;  %v4601_v56 = vpack.c.bf16 %v6036_v15, %v6034_v34  ;;  %v4663_v5 = vpack.c.bf16 %v7025_v29, %v7024_v1  ;;  %v7033_v53 = vand.u32 4294901760, %v5960_v25  ;;  %v7034_v18 = vmov 0 }
  0x9b   :  { %4648 = vmatpush1.bf16.msra.mxu0 %v4647_v32  ;;  %2782 = vmatprep.mubr.f32.mxu0 %v6891_v26  ;;  %v4613_v50 = vpack.c.bf16 %v7029_v45, %v7028_v7  ;;  %v4615_v55 = vpack.c.bf16 %v2067_v24, %v2055_v36  ;;  %v7039_v25 = vand.u32 4294901760, %v6022_v59  ;;  %v7046_v8 = vand.u32 4294901760, %v6036_v15 }
  0x9c   :  { %4650 = vmatprep.subr.bf16.mxu0 %v4649_v3  ;;  %v4665_v51 = vpack.c.bf16 %v7033_v53, %v7032_v10  ;;  %v7051_v34 = vand.u32 4294901760, %v6082_v57  ;;  %v7052_v15 = vand.u32 4294901760, %v6084_v62 }
  0x9d   :  { %4596 = vmatpush1.bf16.msra.mxu1 %v4595_v20  ;;  %v4617_v59 = vpack.c.bf16 %v7046_v8, %v2073_v43 }
  0x9e   :  { %4598 = vmatprep.subr.bf16.mxu1 %v4597_v0  ;;  %v4619_v43 = vpack.c.bf16 %v7052_v15, %v7051_v34 }
  0x9f   :  { %4652 = vmatpush1.bf16.msra.mxu0 %v4651_v22 }
  0xa0   :  { %2153 = vmatmul.mubr.f32.vlgmr.msra.gmra.mrb[4].mxu1 %v5214_v44  ;;  %4654 = vmatprep.subr.msk.bf16.mxu0 %vm6049_vm2, %v6888_v37 }
  0xa1   :  { %4600 = vmatpush1.bf16.msra.mxu1 %v4599_v40  ;;  %2239 = vmatprep.mubr.f32.mxu1 %v6891_v26 }
  0xa2   :  { %4602 = vmatprep.subr.bf16.mxu1 %v4601_v56  ;;  %2785 = vmatmul.mubr.f32.vlgmr.msra.gmra.mrb[4].mxu0 %v5242_v52 }
  0xa3   :  { %4656 = vmatpush1.bf16.msk.msra.mxu0 %vm6078_vm1, %v6888_v37  ;;  %2863 = vmatprep.mubr.f32.mxu0 %v6891_v26 }
  0xa4   :  { %4658 = vmatprep.subr.msk.bf16.mxu0 %vm6115_vm11, %v6888_v37  ;;  %vm146_vm11 = vcmp.lt.s32.totalorder %v6235_v31, %v4981_v13  ;;  %v4084_v13 = vld [vmem:[#allocation5 + $0x38] sm:$0xff] }
  0xa5   :  { %4604 = vmatpush1.bf16.msra.mxu1 %v4603_v54 }
  0xa6   :  { %4606 = vmatprep.subr.msk.bf16.mxu1 %vm6098_vm10, %v6888_v37  ;;  %vm6281_vm10 = vmand %vm91_vm12, %vm147_vm14  ;;  %vm160_vm14 = vcmp.lt.s32.totalorder %v6227_v39, %v4989_v14 }
  0xa7   :  { %4660 = vmatpush1.bf16.msk.msra.mxu0 %vm6158_vm5, %v6888_v37  ;;  %vm6299_vm12 = vmand %vm77_vm0, %vm133_vm8  ;;  %vm104_vm8 = vcmp.ge.s32.totalorder %v6227_v39, %v4975_v11 }
  0xa8   :  { %2242 = vmatmul.mubr.f32.vlgmr.msra.gmra.mrb[4].mxu1 %v5242_v52  ;;  %4662 = vmatprep.subr.bf16.mxu0 %v4661_v48  ;;  %vm6320_vm0 = vmand %vm90_vm15, %vm146_vm11  ;;  %vm159_vm15 = vcmp.lt.s32.totalorder %v6235_v31, %v4989_v14  ;;  %v4144_v36 = vsel %vm6299_vm12, 1.0, %v6891_v26  ;;  %vm7053_vm11 = vcmp.ge.s32.totalorder %v6235_v31, %v4975_v11 }
  0xa9   :  { %4608 = vmatpush1.bf16.msk.msra.mxu1 %vm6136_vm7, %v6888_v37  ;;  %v7035_v18 = vsel %vm6320_vm0, 4294967295, %v7034_v18  ;;  %2320 = vmatprep.mubr.f32.mxu1 %v6891_v26  ;;  %v4157_v24 = vsel %vm6320_vm0, 1.0, %v6891_v26  ;;  %vm7056_vm0 = vcmp.lt.s32.totalorder %v6235_v31, %v5000_v17  ;;  %v6441_v0 = vsub.f32 %v4144_v36, %v4144_v36 }
  0xaa   :  { %4610 = vmatprep.subr.msk.bf16.mxu1 %vm6173_vm9, %v6888_v37  ;;  %vm7036_vm9 = vcmp.ge.s32.totalorder %v6244_v49, %v4965_v6  ;;  %2867 = vmatmul.mubr.f32.vlgmr.msra.gmra.mrb[4].mxu0 %v6964_v23  ;;  %v7040_v6 = vand.u32 4294901760, %v6024_v21  ;;  %v4145_v21 = vsel %vm6268_vm4, 1.0, %v6891_v26  ;;  %v6443_v3 = vsub.f32 %v4157_v24, %v4157_v24 }
  0xab   :  { %vm6332_vm5 = vmand %vm7036_vm9, %vm132_vm3  ;;  %vm7041_vm9 = vcmp.ge.s32.totalorder %v6244_v49, %v4967_v9  ;;  %4664 = vmatpush1.bf16.msra.mxu0 %v4663_v5  ;;  %v4158_v9 = vsel %vm6281_vm10, 1.0, %v6891_v26  ;;  %2961 = vmatprep.mubr.f32.mxu0 %v6891_v26  ;;  %v6423_v62 = vsub.f32 %v4145_v21, %v4145_v21 }
  0xac   :  { %v4667_v38 = vpack.c.bf16 %v7040_v6, %v7039_v25  ;;  %vm6352_vm3 = vmand %vm7041_vm9, %vm145_vm13  ;;  %4666 = vmatprep.subr.bf16.mxu0 %v4665_v51  ;;  %v6425_v57 = vsub.f32 %v4158_v9, %v4158_v9  ;;  %v4143_v40 = vsel %vm6332_vm5, 1.0, %v6891_v26  ;;  %v3147_v1 = vand.u32 4294901760, %v6443_v3 }
  0xad   :  { %4612 = vmatpush1.bf16.msk.msra.mxu1 %vm6197_vm6, %v6888_v37  ;;  %vm6375_vm13 = vmand %vm104_vm8, %vm160_vm14  ;;  %vm7047_vm14 = vcmp.lt.s32.totalorder %v6227_v39, %v5000_v17  ;;  %vm7048_vm8 = vcmp.ge.s32.totalorder %v6227_v39, %v4977_v12  ;;  %v4156_v22 = vsel %vm6352_vm3, 1.0, %v6891_v26  ;;  %v3674_v28 = vand.u32 4294901760, %v6423_v62 }
  0xae   :  { %4614 = vmatprep.subr.bf16.mxu1 %v4613_v50  ;;  %vm6399_vm9 = vmand %vm7048_vm8, %vm7047_vm14  ;;  %vm171_vm8 = vcmp.lt.s32.totalorder %v6244_v49, %v5000_v17  ;;  %v4171_v56 = vsel %vm6375_vm13, 1.0, %v6891_v26  ;;  %v6490_v2 = vsub.f32 %v4156_v22, %v4156_v22  ;;  %v3681_v48 = vand.u32 4294901760, %v6425_v57 }
  0xaf   :  { %vm6414_vm6 = vmand %vm7053_vm11, %vm159_vm15  ;;  %vm7057_vm11 = vcmp.ge.s32.totalorder %v6235_v31, %v4977_v12  ;;  %4668 = vmatpush1.bf16.msra.mxu0 %v4667_v38  ;;  %v4184_v39 = vsel %vm6399_vm9, 1.0, %v6891_v26  ;;  %v4918_v25 = vmov 0.0|0.0  }
  0xb0   :  { %2324 = vmatmul.mubr.f32.vlgmr.msra.gmra.mrb[4].mxu1 %v6964_v23  ;;  %vm6433_vm15 = vmand %vm7057_vm11, %vm7056_vm0  ;;  %4670 = vmatprep.subr.msk.bf16.mxu0 %vm6049_vm2, %v6888_v37  ;;  %vm7060_vm0 = vcmp.lt.s32.totalorder %v6244_v49, %v4989_v14  ;;  %vm7061_vm11 = vcmp.ge.s32.totalorder %v6244_v49, %v4975_v11  ;;  %v4170_v42 = vsel %vm6414_vm6, 1.0, %v6891_v26  ;;  %vm7064_vm2 = vcmp.ge.s32.totalorder %v6244_v49, %v4977_v12 }
  0xb1   :  { %4616 = vmatpush1.bf16.msra.mxu1 %v4615_v55  ;;  %vm6466_vm14 = vmand %vm7061_vm11, %vm7060_vm0  ;;  %2418 = vmatprep.mubr.f32.mxu1 %v6891_v26  ;;  %v4183_v31 = vsel %vm6433_vm15, 1.0, %v6891_v26  ;;  %v6488_v14 = vsub.f32 %v4143_v40, %v4143_v40  ;;  %v6497_v12 = vsub.f32 %v4171_v56, %v4171_v56  ;;  %v6499_v17 = vsub.f32 %v4184_v39, %v4184_v39 }
  0xb2   :  { %4618 = vmatprep.subr.bf16.mxu1 %v4617_v59  ;;  %vm6483_vm0 = vmand %vm7064_vm2, %vm171_vm8  ;;  %2963 = vmatmul.mubr.f32.vlgmr.msra.gmra.mrb[4].mxu0 %v5214_v44  ;;  %v3135_v49 = vand.u32 4294901760, %v6441_v0  ;;  %vm7067_vm8 = vnez %v7004_v4  ;;  %vm7068_vm11 = vnez %v7008_v30  ;;  %v6509_v29 = vsub.f32 %v4170_v42, %v4170_v42 }
  0xb3   :  { %4672 = vmatpush1.bf16.msk.msra.mxu0 %vm6078_vm1, %v6888_v37  ;;  %v6511_v41 = vsub.f32 %v4183_v31, %v4183_v31  ;;  %v4169_v5 = vsel %vm6466_vm14, 1.0, %v6891_v26  ;;  %v4182_v7 = vsel %vm6483_vm0, 1.0, %v6891_v26  ;;  %3041 = vmatprep.mubr.f32.mxu0 %v6891_v26  ;;  %v3675_v4 = vsub.f32 %v6423_v62, %v3674_v28 }
  0xb4   :  { %4674 = vmatprep.subr.msk.bf16.mxu0 %vm7068_vm11, %v6888_v37  ;;  %v3682_v30 = vsub.f32 %v6425_v57, %v3681_v48  ;;  %v3141_v45 = vand.u32 4294901760, %v6488_v14  ;;  %v3153_v50 = vand.u32 4294901760, %v6490_v2  ;;  %vm7069_vm1 = vnez %v7014_v46 }
  0xb5   :  { %4620 = vmatpush1.bf16.msra.mxu1 %v4619_v43  ;;  %v6535_v10 = vsub.f32 %v4169_v5, %v4169_v5  ;;  %v6537_v53 = vsub.f32 %v4182_v7, %v4182_v7  ;;  %v3688_v51 = vand.u32 4294901760, %v6497_v12  ;;  %v3695_v55 = vand.u32 4294901760, %v6499_v17 }
  0xb6   :  { %4622 = vmatprep.subr.msk.bf16.mxu1 %vm7067_vm8, %v6888_v37  ;;  %vm7070_vm2 = vnez %v7017_v33  ;;  %v3136_v46 = vsub.f32 %v6441_v0, %v3135_v49  ;;  %v3148_v33 = vsub.f32 %v6443_v3, %v3147_v1  ;;  %v3159_v6 = vand.u32 4294901760, %v6509_v29 }
  0xb7   :  { %4676 = vmatpush1.bf16.msk.msra.mxu0 %vm7069_vm1, %v6888_v37  ;;  %v3171_v38 = vand.u32 4294901760, %v6511_v41  ;;  %v3676_v19 = vand.u32 4294901760, %v3675_v4  ;;  %v3683_v21 = vand.u32 4294901760, %v3682_v30  ;;  %v3142_v9 = vsub.f32 %v6488_v14, %v3141_v45 }
  0xb8   :  { %2420 = vmatmul.mubr.f32.vlgmr.msra.gmra.mrb[4].mxu1 %v5214_v44  ;;  %4725 = vmatprep.subr.bf16.mxu0 %v4918_v25  ;;  %v3154_v8 = vsub.f32 %v6490_v2, %v3153_v50  ;;  %vm7076_vm8 = vnez %v7019_v27  ;;  %v3696_v27 = vsub.f32 %v6499_v17, %v3695_v55  ;;  %v3165_v59 = vand.u32 4294901760, %v6535_v10 }
  0xb9   :  { %4624 = vmatpush1.bf16.msk.msra.mxu1 %vm6136_vm7, %v6888_v37  ;;  %vm6549_vm7 = vmpackc.low %vm6281_vm10, %vm6268_vm4  ;;  %2498 = vmatprep.mubr.f32.mxu1 %v6891_v26  ;;  %vm7073_vm10 = vnez %v7035_v18  ;;  %v3689_v18 = vsub.f32 %v6497_v12, %v3688_v51  ;;  %v3177_v36 = vand.u32 4294901760, %v6537_v53  ;;  %v3137_v63 = vand.u32 4294901760, %v3136_v46 }
  0xba   :  { %4626 = vmatprep.subr.msk.bf16.mxu1 %vm7070_vm2, %v6888_v37  ;;  %vm6566_vm4 = vmpackc.low %vm7073_vm10, %vm6299_vm12  ;;  %3043 = vmatmul.mubr.f32.vlgmr.msra.gmra.mrb[4].mxu0 %v5214_v44  ;;  %v3149_v24 = vand.u32 4294901760, %v3148_v33  ;;  %v3160_v34 = vsub.f32 %v6509_v29, %v3159_v6  ;;  %v3172_v15 = vsub.f32 %v6511_v41, %v3171_v38  ;;  %v4732_v47 = vpack.c.bf16 %v3683_v21, %v3676_v19 }
  0xbb   :  { %4727 = vmatpush3.bf16.msk.msra.mxu0 %vm6549_vm7, %v6888_v37  ;;  %vm6587_vm12 = vmpackc.low %vm6352_vm3, %vm6332_vm5  ;;  %vm4919_vm3 = vmmov 0   ;;  %v3143_v43 = vand.u32 4294901760, %v3142_v9  ;;  %v3155_v40 = vand.u32 4294901760, %v3154_v8  ;;  %v3690_v20 = vand.u32 4294901760, %v3689_v18 }
  0xbc   :  { %4728 = vmatprep.subr.bf16.mxu0 %v4918_v25  ;;  %vm6607_vm5 = vmpackc.low %vm6399_vm9, %vm6375_vm13  ;;  %4379 = vmatprep.mubr.msk.f32.mxu0 %vm4919_vm3, %v6891_v26  ;;  %v3697_v22 = vand.u32 4294901760, %v3696_v27  ;;  %v3166_v32 = vsub.f32 %v6535_v10, %v3165_v59  ;;  %v3178_v56 = vsub.f32 %v6537_v53, %v3177_v36  ;;  %v4685_v42 = vpack.c.bf16 %v3149_v24, %v3137_v63 }
  0xbd   :  { %4628 = vmatpush1.bf16.msk.msra.mxu1 %vm7076_vm8, %v6888_v37  ;;  %vm6623_vm13 = vmpackc.low %vm6433_vm15, %vm6414_vm6  ;;  %v3161_v31 = vand.u32 4294901760, %v3160_v34  ;;  %v3173_v5 = vand.u32 4294901760, %v3172_v15  ;;  %v4687_v7 = vpack.c.bf16 %v3155_v40, %v3143_v43  ;;  %v4738_v33 = vpack.c.bf16 %v6425_v57, %v6423_v62 }
  0xbe   :  { %4678 = vmatprep.subr.msk.bf16.mxu1 %vm6566_vm4, %v6888_v37  ;;  %vm6648_vm6 = vmpackc.low %vm6483_vm0, %vm6466_vm14  ;;  %v4735_v54 = vpack.c.bf16 %v3697_v22, %v3690_v20  ;;  %v3167_v4 = vand.u32 4294901760, %v3166_v32  ;;  %v3179_v11 = vand.u32 4294901760, %v3178_v56  ;;  %v4693_v19 = vpack.c.bf16 %v6443_v3, %v6441_v0  ;;  %v4087_v20 = vld [vmem:[#allocation5 + $0x50] sm:$0xff]  ;;  %v4088_v22 = vld [vmem:[#allocation5 + $0x58] sm:$0xff] }
  0xbf   :  { %4730 = vmatpush3.bf16.msk.msra.mxu0 %vm6607_vm5, %v6888_v37  ;;  %v4689_v30 = vpack.c.bf16 %v3173_v5, %v3161_v31  ;;  %v4741_v21 = vpack.c.bf16 %v6499_v17, %v6497_v12  ;;  %v4697_v9 = vpack.c.bf16 %v6511_v41, %v6509_v29  ;;  %v4699_v8 = vpack.c.bf16 %v6537_v53, %v6535_v10  ;;  %v4078_v17 = vld [vmem:[#allocation5 + $0x8] sm:$0xff]  ;;  %v4079_v53 = vld [vmem:[#allocation5 + $0x10] sm:$0xff] }
  0xc0   :  { %2500 = vmatmul.mubr.f32.vlgmr.msra.gmra.mrb[4].mxu1 %v5214_v44  ;;  %4731 = vmatprep.subr.bf16.mxu0 %v4918_v25  ;;  %v4691_v46 = vpack.c.bf16 %v3179_v11, %v3167_v4  ;;  %v4750_v18 = vpack.c.bf16 %v3681_v48, %v3674_v28  ;;  %v4711_v62 = vpack.c.bf16 %v3153_v50, %v3141_v45  ;;  %v4077_v28 = vld [vmem:[#allocation5] sm:$0xff]  ;;  %v4082_v41 = vld [vmem:[#allocation5 + $0x28] sm:$0xff]  ;;  %vm7085_vm9 = vcmask 261120  }
  0xc1   :  { %4680 = vmatpush1.bf16.msk.msra.mxu1 %vm6587_vm12, %v6888_v37  ;;  %3121 = vmatprep.mubr.f32.mxu1 %v6891_v26  ;;  %v4753_v57 = vpack.c.bf16 %v3695_v55, %v3688_v51  ;;  %v4713_v0 = vpack.c.bf16 %v3171_v38, %v3159_v6  ;;  %v4715_v3 = vpack.c.bf16 %v3177_v36, %v3165_v59  ;;  %v4085_v6 = vld [vmem:[#allocation5 + $0x40] sm:$0xff]  ;;  %v4086_v38 = vld [vmem:[#allocation5 + $0x48] sm:$0xff]  ;;  %v4083_v36 = vld [vmem:[#allocation5 + $0x30] sm:$0xff] }
  0xc2   :  { %4682 = vmatprep.subr.msk.bf16.mxu1 %vm6623_vm13, %v6888_v37  ;;  %4380 = vmatmul.mubr.f32.vlgmr.msra.gmra.mrb[6].mxu0 %v5328_v16 }
  0xc3   :  { %4733 = vmatpush3.bf16.msra.mxu0 %v4732_v47  ;;  %4390 = vmatprep.mubr.msk.f32.mxu0 %vm4919_vm3, %v6891_v26 }
  0xc4   :  { %4734 = vmatprep.subr.bf16.mxu0 %v4918_v25 }
  0xc5   :  { %4684 = vmatpush1.bf16.msk.msra.mxu1 %vm6648_vm6, %v6888_v37 }
  0xc6   :  { %4686 = vmatprep.subr.bf16.mxu1 %v4685_v42 }
  0xc7   :  { %4736 = vmatpush3.bf16.msra.mxu0 %v4735_v54 }
  0xc8   :  { %3127 = vmatmul.mubr.f32.vlgmr.msra.gmra.mrb[6].mxu1 %v5328_v16  ;;  %4737 = vmatprep.subr.bf16.mxu0 %v4918_v25  ;;  %v4695_v16 = vpack.c.bf16 %v6490_v2, %v6488_v14 }
  0xc9   :  { %4688 = vmatpush1.bf16.msra.mxu1 %v4687_v7  ;;  %3237 = vmatprep.mubr.f32.mxu1 %v6891_v26 }
  0xca   :  { %4690 = vmatprep.subr.bf16.mxu1 %v4689_v30  ;;  %4391 = vmatmul.mubr.f32.vlgmr.msra.gmra.mrb[6].mxu0 %v5214_v44 }
  0xcb   :  { %4739 = vmatpush3.bf16.msra.mxu0 %v4738_v33  ;;  %4401 = vmatprep.mubr.msk.f32.mxu0 %vm4919_vm3, %v6891_v26 }
  0xcc   :  { %4740 = vmatprep.subr.bf16.mxu0 %v4918_v25 }
  0xcd   :  { %4692 = vmatpush1.bf16.msra.mxu1 %v4691_v46 }
  0xce   :  { %4694 = vmatprep.subr.bf16.mxu1 %v4693_v19 }
  0xcf   :  { %4742 = vmatpush3.bf16.msra.mxu0 %v4741_v21 }
  0xd0   :  { %3239 = vmatmul.mubr.f32.vlgmr.msra.gmra.mrb[6].mxu1 %v5214_v44  ;;  %4743 = vmatprep.subr.bf16.mxu0 %v4918_v25 }
  0xd1   :  { %4696 = vmatpush1.bf16.msra.mxu1 %v4695_v16  ;;  %3325 = vmatprep.mubr.f32.mxu1 %v6891_v26 }
  0xd2   :  { %4698 = vmatprep.subr.bf16.mxu1 %v4697_v9  ;;  %4402 = vmatmul.mubr.f32.vlgmr.msra.gmra.mrb[6].mxu0 %v5242_v52 }
  0xd3   :  { %4745 = vmatpush3.bf16.msk.msra.mxu0 %vm6549_vm7, %v6888_v37  ;;  %4412 = vmatprep.mubr.msk.f32.mxu0 %vm4919_vm3, %v6891_v26 }
  0xd4   :  { %4746 = vmatprep.subr.bf16.mxu0 %v4918_v25 }
  0xd5   :  { %4700 = vmatpush1.bf16.msra.mxu1 %v4699_v8 }
  0xd6   :  { %4702 = vmatprep.subr.msk.bf16.mxu1 %vm6566_vm4, %v6888_v37 }
  0xd7   :  { %4748 = vmatpush3.bf16.msk.msra.mxu0 %vm6607_vm5, %v6888_v37 }
  0xd8   :  { %3328 = vmatmul.mubr.f32.vlgmr.msra.gmra.mrb[6].mxu1 %v5242_v52  ;;  %4749 = vmatprep.subr.bf16.mxu0 %v4918_v25  ;;  %v4709_v52 = vpack.c.bf16 %v3147_v1, %v3135_v49 }
  0xd9   :  { %4704 = vmatpush1.bf16.msk.msra.mxu1 %vm6587_vm12, %v6888_v37  ;;  %3406 = vmatprep.mubr.f32.mxu1 %v6891_v26 }
  0xda   :  { %4706 = vmatprep.subr.msk.bf16.mxu1 %vm6623_vm13, %v6888_v37  ;;  %4413 = vmatmul.mubr.f32.vlgmr.msra.gmra.mrb[6].mxu0 %v6964_v23 }
  0xdb   :  { %4751 = vmatpush3.bf16.msra.mxu0 %v4750_v18  ;;  %4423 = vmatprep.mubr.msk.f32.mxu0 %vm4919_vm3, %v6891_v26 }
  0xdc   :  { %4752 = vmatprep.subr.bf16.mxu0 %v4918_v25 }
  0xdd   :  { %4708 = vmatpush1.bf16.msk.msra.mxu1 %vm6648_vm6, %v6888_v37 }
  0xde   :  { %4710 = vmatprep.subr.bf16.mxu1 %v4709_v52 }
  0xdf   :  { %4754 = vmatpush3.bf16.msra.mxu0 %v4753_v57 }
  0xe0   :  { %3410 = vmatmul.mubr.f32.vlgmr.msra.gmra.mrb[6].mxu1 %v6964_v23  ;;  %4755 = vmatprep.subr.bf16.mxu0 %v4918_v25 }
  0xe1   :  { %4712 = vmatpush1.bf16.msra.mxu1 %v4711_v62  ;;  %3504 = vmatprep.mubr.f32.mxu1 %v6891_v26 }
  0xe2   :  { %4714 = vmatprep.subr.bf16.mxu1 %v4713_v0  ;;  %4424 = vmatmul.mubr.f32.vlgmr.msra.gmra.mrb[6].mxu0 %v5214_v44 }
  0xe3   :  { %4757 = vmatpush3.bf16.msk.msra.mxu0 %vm6549_vm7, %v6888_v37  ;;  %4434 = vmatprep.mubr.msk.f32.mxu0 %vm4919_vm3, %v6891_v26 }
  0xe4   :  { %4758 = vmatprep.subr.bf16.mxu0 %v4918_v25 }
  0xe5   :  { %4716 = vmatpush1.bf16.msra.mxu1 %v4715_v3 }
  0xe6   :  { %4718 = vmatprep.subr.msk.bf16.mxu1 %vm6566_vm4, %v6888_v37 }
  0xe7   :  { %4760 = vmatpush3.bf16.msk.msra.mxu0 %vm6607_vm5, %v6888_v37 }
  0xe8   :  { %3506 = vmatmul.mubr.f32.vlgmr.msra.gmra.mrb[6].mxu1 %v5214_v44 }
  0xe9   :  { %4720 = vmatpush1.bf16.msk.msra.mxu1 %vm6587_vm12, %v6888_v37  ;;  %3584 = vmatprep.mubr.f32.mxu1 %v6891_v26  ;;  %v4081_v26 = vld [vmem:[#allocation5 + $0x20] sm:$0xff] }
  0xea   :  { %4722 = vmatprep.subr.msk.bf16.mxu1 %vm6623_vm13, %v6888_v37  ;;  %4435 = vmatmul.mubr.f32.vlgmr.msra.gmra.mrb[6].mxu0 %v5214_v44 }
  0xed   :  { %4724 = vmatpush1.bf16.msk.msra.mxu1 %vm6648_vm6, %v6888_v37 }
  0xf0   :  { %3586 = vmatmul.mubr.f32.vlgmr.msra.gmra.mrb[6].mxu1 %v5214_v44  ;;  %v4080_v44 = vld [vmem:[#allocation5 + $0x18] sm:$0xff] }
 0x12d   :  { %v872_v23 = vpop.f32.mrb[0].mxu0 }
 0x12e   :  { %v874_v14 = vpop.f32.mrb[1].mxu0 }
 0x133   :  { %v614_v2 = vpop.f32.mrb[0].mxu1 }
 0x134   :  { %v4761_v48 = vadd.f32 %v872_v23, %v614_v2  ;;  %v616_v12 = vpop.f32.mrb[1].mxu1 }
 0x135   :  { %v4762_v49 = vadd.f32 %v874_v14, %v616_v12 }
 0x136   :  { %v4090_v1 = vmul.f32 %v4761_v48, %v4077_v28 }
 0x137   :  { %v4091_v29 = vmul.f32 %v4762_v49, %v4078_v17 }
 0x138   :  { %4103 = vst [vmem:[#allocation7] sm:$0xff] %v4090_v1 }
 0x139   :  { %4104 = vst [vmem:[#allocation7 + $0x8] sm:$0xff] %v4091_v29 }
 0x15d   :  { %v1958_v45 = vpop.f32.mrb[2].mxu0 }
 0x15e   :  { %v4094_v50 = vmul.f32 %v4081_v26, %v1958_v45  ;;  %v1960_v10 = vpop.f32.mrb[3].mxu0 }
 0x15f   :  { %v4095_v37 = vmul.f32 %v4082_v41, %v1960_v10 }
 0x160   :  { %4107 = vst [vmem:[#allocation7 + $0x20] sm:$0xff] %v4094_v50 }
 0x161   :  { %4108 = vst [vmem:[#allocation7 + $0x28] sm:$0xff] %v4095_v37 }
 0x163   :  { %v1415_v51 = vpop.f32.mrb[2].mxu1 }
 0x164   :  { %v4092_v55 = vmul.f32 %v4079_v53, %v1415_v51  ;;  %v1417_v25 = vpop.f32.mrb[3].mxu1 }
 0x165   :  { %v4093_v58 = vmul.f32 %v4080_v44, %v1417_v25 }
 0x166   :  { %4105 = vst [vmem:[#allocation7 + $0x10] sm:$0xff] %v4092_v55 }
 0x167   :  { %4106 = vst [vmem:[#allocation7 + $0x18] sm:$0xff] %v4093_v58 }
 0x18d   :  { %v3044_v61 = vpop.f32.mrb[4].mxu0 }
 0x18e   :  { %v4098_v35 = vmul.f32 %v4085_v6, %v3044_v61  ;;  %v3046_v27 = vpop.f32.mrb[5].mxu0 }
 0x18f   :  { %v4099_v59 = vmul.f32 %v4086_v38, %v3046_v27 }
 0x190   :  { %4111 = vst [vmem:[#allocation7 + $0x40] sm:$0xff] %v4098_v35 }
 0x191   :  { %4112 = vst [vmem:[#allocation7 + $0x48] sm:$0xff] %v4099_v59 }
 0x193   :  { %v2501_v63 = vpop.f32.mrb[4].mxu1 }
 0x194   :  { %v4096_v24 = vmul.f32 %v4083_v36, %v2501_v63  ;;  %v2503_v34 = vpop.f32.mrb[5].mxu1 }
 0x195   :  { %v4097_v15 = vmul.f32 %v4084_v13, %v2503_v34 }
 0x196   :  { %4109 = vst [vmem:[#allocation7 + $0x30] sm:$0xff] %v4096_v24 }
 0x197   :  { %4110 = vst [vmem:[#allocation7 + $0x38] sm:$0xff] %v4097_v15 }
 0x1bd   :  { %v4073_v47 = vpop.f32.mrb[6].mxu0 }
 0x1be   :  { %v4102_v43 = vmul.f32 %v4089_v60, %v4073_v47  ;;  %v4436_v40 = vpop.f32.mrb[7].mxu0 }
 0x1c0   :  { %4115 = vst.msk [vmem:[#allocation7 + $0x60] sm:$0xff] %vm7085_vm9, %v4102_v43 }
 0x1c3   :  { %v3587_v32 = vpop.f32.mrb[6].mxu1 }
 0x1c4   :  { %v4100_v56 = vmul.f32 %v4087_v20, %v3587_v32  ;;  %v3589_v39 = vpop.f32.mrb[7].mxu1 }
 0x1c5   :  { %v4101_v42 = vmul.f32 %v4088_v22, %v3589_v39 }
 0x1c6   :  { %4113 = vst [vmem:[#allocation7 + $0x50] sm:$0xff] %v4100_v56 }
 0x1c7   :  { %4114 = vst [vmem:[#allocation7 + $0x58] sm:$0xff] %v4101_v42 }
 0x1c8   :  { %4897 = shalt.err (!%p4894_p6)
}
 0x1c9   :  { %s4898_s8 = scalar_lea.hbm %s6779_s2, 1664 }
 0x1ca   :  { %p4899_p7 = scmp.ne.s32.totalorder %s6779_s2, %s4898_s8  ;;  %p4902_p8 = scmp.lt.u32.totalorder %s4898_s8, %s6779_s2 }
 0x1cc   :  { %p4904_p9 = pnand %p4902_p8, %p4899_p7 }
 0x1ce   :  { %4907 = shalt.err (!%p4904_p9)
}
 0x1cf   :  { %4125 = dma.vmem_to_hbm [thread:$0]  %s4123_s4, 1664, %s6779_s2, [#allocation4]  }
 0x1d0   :  { %4912 = dma.done.wait [#allocation4], 1664  }
 0x1d1   :  { %4913 = vsyncadd [#allocation4], 4294965632 }
 0x1d2   :  { %4129 = vsyncpa [#allocation3], 1 }
 0x1d3   :  { %4130 = vsyncpa [#allocation6], 1 }
 0x1d4   :  { %4131 = vsyncpa [#allocation4], 1 }

</bundles_post_ra>
